<compile_context>
chip_gen: v5e
topology: v5e:2x2
jax: 0.10.0
libtpu: 0.0.40
codegen_flags: <defaults>
</compile_context>

<pallas_src>
import functools

import jax
import jax.numpy as jnp
from jax.experimental import pallas as pl
from jax.experimental.pallas import tpu as pltpu

LANE = 128   # TPU lane width: channel axes are zero-padded to this
BPAD = 8     # graph-batch axis padded to one sublane group


# ---------------------------------------------------------------------------
# Fused Pallas kernel: entire GNN forward in one call, intermediates in VMEM
# ---------------------------------------------------------------------------

def _net_fused_kernel(ope_ref,                                   # SMEM (L,) f32: 1+eps per layer
                      h0_ref, bcast_ref, gsrc_ref, sdst_ref,      # node emb, structural matrices
                      psum_ref, invc_ref,
                      e_ref,                                      # (L,E,Dp) edge embeddings
                      w1_ref, s1_ref, sh1_ref, w2_ref, s2_ref, sh2_ref,       # GINE MLP (+folded BN)
                      vw1_ref, vs1_ref, vsh1_ref, vw2_ref, vs2_ref, vsh2_ref,  # VN MLP (+folded BN)
                      dw_ref, db_ref,                             # downstream Linear (per-layer blocks)
                      out_ref,
                      *, num_layers):
    f32 = jnp.float32
    bf16 = jnp.bfloat16

    h = h0_ref[...]            # (N, Dp) f32 node features (layer 0 input)
    bcast = bcast_ref[...]     # (N, Bp) f32 one-hot graph-id broadcast
    gsrc = gsrc_ref[...]       # (E, N)  bf16 one-hot gather  h[src]
    sdst = sdst_ref[...]       # (N, E)  bf16 one-hot scatter sum-to-dst
    psum = psum_ref[...]       # (Bp, N) bf16 per-graph sum pooling
    invc = invc_ref[...]       # (Bp, 1) f32 1/num_nodes (0 for padded graphs)

    Bp = psum.shape[0]
    Dp = h.shape[1]
    vx = jnp.zeros((Bp, Dp), f32)          # virtual-node embedding (init 0)
    acc = jnp.zeros(out_ref.shape, f32)    # downstream-head accumulator

    for l in range(num_layers):
        last = l == num_layers - 1

        # VirtualNode.update_node_emb: h = x + vx[batch_id]
        h_in = h + jnp.dot(bcast, vx, preferred_element_type=f32)

        # GINEConv: msg = relu(h[src] + e); agg = scatter-sum; rst = (1+eps)*h + agg
        h_src = jnp.dot(gsrc, h_in.astype(bf16), preferred_element_type=f32)
        msg = jnp.maximum(h_src + e_ref[l], 0.0)
        agg = jnp.dot(sdst, msg.astype(bf16), preferred_element_type=f32)
        rst = ope_ref[l] * h_in + agg

        # apply_func MLP (Lin -> BN -> ReLU -> Lin) + ConvBlock BN (+ReLU unless last)
        t = jnp.dot(rst.astype(bf16), w1_ref[l], preferred_element_type=f32)
        t = jnp.maximum(t * s1_ref[l] + sh1_ref[l], 0.0)
        h_new = jnp.dot(t.astype(bf16), w2_ref[l], preferred_element_type=f32)
        h_new = h_new * s2_ref[l] + sh2_ref[l]
        if not last:
            h_new = jnp.maximum(h_new, 0.0)
        # Dropout: identity in eval mode

        # SumPooling over nodes (shared by the VN update and the mean readout)
        pooled = jnp.dot(psum, h_new.astype(bf16), preferred_element_type=f32)

        # JK='cat' + mean readout + downstream Linear: accumulate this layer's block
        acc = acc + jnp.dot((pooled * invc).astype(bf16), dw_ref[l],
                            preferred_element_type=f32)

        # VirtualNode.update_vn_emb (residual=True; eval-mode dropout = identity)
        v = pooled + vx
        v = jnp.dot(v.astype(bf16), vw1_ref[l], preferred_element_type=f32)
        v = jnp.maximum(v * vs1_ref[l] + vsh1_ref[l], 0.0)
        v = jnp.dot(v.astype(bf16), vw2_ref[l], preferred_element_type=f32)
        v = jnp.maximum(v * vs2_ref[l] + vsh2_ref[l], 0.0)
        vx = vx + v

        h = h_new

    out_ref[...] = acc + db_ref[...]


def _full_spec(shape):
    zeros = (0,) * len(shape)
    return pl.BlockSpec(shape, lambda i, _z=zeros: _z)


# ---------------------------------------------------------------------------
# Parameters (deterministic synthetic init, mirrors PyTorch module layout)
# ---------------------------------------------------------------------------

def init_params(key, num_node_emb_list, num_edge_emb_list, emb_dim, num_layers, n_tasks):
    keys = iter(jax.random.split(key, 256))

    def nrm(shape, scale=0.1):
        return scale * jax.random.normal(next(keys), shape, jnp.float32)

    def bn(dim):
        return dict(
            gamma=1.0 + 0.1 * jax.random.normal(next(keys), (dim,), jnp.float32),
            beta=0.1 * jax.random.normal(next(keys), (dim,), jnp.float32),
            mean=0.05 * jax.random.normal(next(keys), (dim,), jnp.float32),
            var=jnp.ones((dim,), jnp.float32),
        )

    params = dict(
        node_emb=[nrm((n, emb_dim)) for n in num_node_emb_list],
        layers=[],
        down_w=nrm((emb_dim * num_layers, n_tasks)),
        down_b=nrm((n_tasks,)),
    )
    for _ in range(num_layers):
        params["layers"].append(dict(
            edge_emb=[nrm((n, emb_dim)) for n in num_edge_emb_list],
            eps=jnp.float32(0.0),                         # GINE learn_eps, init 0
            mlp_w1=nrm((emb_dim, 2 * emb_dim)), mlp_b1=nrm((2 * emb_dim,)),
            mlp_bn1=bn(2 * emb_dim),
            mlp_w2=nrm((2 * emb_dim, emb_dim)), mlp_b2=nrm((emb_dim,)),
            conv_bn=bn(emb_dim),                          # ConvBlock BatchNorm
            vn_w1=nrm((emb_dim, 2 * emb_dim)), vn_b1=nrm((2 * emb_dim,)),
            vn_bn1=bn(2 * emb_dim),
            vn_w2=nrm((2 * emb_dim, emb_dim)), vn_b2=nrm((emb_dim,)),
            vn_bn2=bn(emb_dim),
        ))
    return params


def bn_fold(bn, lin_bias, eps=1e-5):
    """Fold (Linear bias -> BatchNorm eval) into a per-channel scale/shift."""
    a = bn["gamma"] / jnp.sqrt(bn["var"] + eps)
    shift = (lin_bias - bn["mean"]) * a + bn["beta"]
    return a, shift


def _pad2d(x, rows, cols):
    x = jnp.asarray(x, jnp.float32)
    out = jnp.zeros((rows, cols), jnp.float32)
    return out.at[: x.shape[0], : x.shape[1]].set(x)


def _pad_row(v, cols):
    v = jnp.asarray(v, jnp.float32).reshape(1, -1)
    out = jnp.zeros((1, cols), jnp.float32)
    return out.at[:, : v.shape[1]].set(v)


# ---------------------------------------------------------------------------
# Forward pass (host-side packing/folding glue + single fused pallas_call)
# ---------------------------------------------------------------------------

@functools.partial(jax.jit, static_argnames=("num_graphs",))
def net_forward(params, graph, x_cat, w_cat, *, num_graphs):
    bf16 = jnp.bfloat16
    layers = params["layers"]
    L = len(layers)
    N = x_cat.shape[0]
    E = w_cat.shape[0]
    D = params["node_emb"][0].shape[1]
    n_tasks = params["down_w"].shape[1]

    Dp = -(-D // LANE) * LANE            # padded emb dim       (-> 128)
    Dh = -(-(2 * D) // LANE) * LANE      # padded hidden dim    (-> 128)
    Tp = -(-n_tasks // LANE) * LANE      # padded n_tasks       (-> 128)

    # CIKMEmbedding / CategoricalEmbedding: sum of per-feature embedding lookups (glue).
    # (degree embedding is skipped -> reproduces the hasattr('degree_emb') typo)
    h0 = jnp.zeros((N, D), jnp.float32)
    for i, tbl in enumerate(params["node_emb"]):
        h0 = h0 + tbl[x_cat[:, i]]
    h0 = _pad2d(h0, N, Dp)

    # Per-layer edge embeddings + folded/padded/stacked weights.
    down_w = params["down_w"]
    ope, e_all = [], []
    w1_all, s1_all, sh1_all = [], [], []
    w2_all, s2_all, sh2_all = [], [], []
    vw1_all, vs1_all, vsh1_all = [], [], []
    vw2_all, vs2_all, vsh2_all = [], [], []
    dw_all = []
    for l, lp in enumerate(layers):
        ope.append(1.0 + lp["eps"])
        e_l = jnp.zeros((E, D), jnp.float32)
        for i, tbl in enumerate(lp["edge_emb"]):
            e_l = e_l + tbl[w_cat[:, i]]
        e_all.append(_pad2d(e_l, E, Dp))

        s1, b1 = bn_fold(lp["mlp_bn1"], lp["mlp_b1"])
        s2, b2 = bn_fold(lp["conv_bn"], lp["mlp_b2"])
        sv1, bv1 = bn_fold(lp["vn_bn1"], lp["vn_b1"])
        sv2, bv2 = bn_fold(lp["vn_bn2"], lp["vn_b2"])

        w1_all.append(_pad2d(lp["mlp_w1"], Dp, Dh))
        s1_all.append(_pad_row(s1, Dh)); sh1_all.append(_pad_row(b1, Dh))
        w2_all.append(_pad2d(lp["mlp_w2"], Dh, Dp))
        s2_all.append(_pad_row(s2, Dp)); sh2_all.append(_pad_row(b2, Dp))
        vw1_all.append(_pad2d(lp["vn_w1"], Dp, Dh))
        vs1_all.append(_pad_row(sv1, Dh)); vsh1_all.append(_pad_row(bv1, Dh))
        vw2_all.append(_pad2d(lp["vn_w2"], Dh, Dp))
        vs2_all.append(_pad_row(sv2, Dp)); vsh2_all.append(_pad_row(bv2, Dp))
        dw_all.append(_pad2d(down_w[l * D:(l + 1) * D], Dp, Tp))

    one_plus_eps = jnp.stack(ope).astype(jnp.float32)                 # (L,)  -> SMEM
    e_all = jnp.stack(e_all).astype(bf16)                             # (L,E,Dp)
    w1_all = jnp.stack(w1_all).astype(bf16)
    s1_all = jnp.stack(s1_all); sh1_all = jnp.stack(sh1_all)          # (L,1,Dh) f32
    w2_all = jnp.stack(w2_all).astype(bf16)
    s2_all = jnp.stack(s2_all); sh2_all = jnp.stack(sh2_all)          # (L,1,Dp) f32
    vw1_all = jnp.stack(vw1_all).astype(bf16)
    vs1_all = jnp.stack(vs1_all); vsh1_all = jnp.stack(vsh1_all)
    vw2_all = jnp.stack(vw2_all).astype(bf16)
    vs2_all = jnp.stack(vs2_all); vsh2_all = jnp.stack(vsh2_all)
    dw_all = jnp.stack(dw_all).astype(bf16)                           # (L,Dp,Tp)
    db_pad = _pad_row(params["down_b"], Tp)                           # (1,Tp) f32

    # Structural matrices (built once on host, cast for the MXU here).
    bcast = graph["bcast"].astype(jnp.float32)        # (N, Bp)
    gsrc = graph["gsrc"].astype(bf16)                 # (E, N)
    sdst = graph["sdst"].astype(bf16)                 # (N, E)
    psum = graph["psum"].astype(bf16)                 # (Bp, N)
    invc = graph["inv_count"].astype(jnp.float32)     # (Bp, 1)
    Bp = psum.shape[0]

    tensor_args = (h0, bcast, gsrc, sdst, psum, invc, e_all,
                   w1_all, s1_all, sh1_all, w2_all, s2_all, sh2_all,
                   vw1_all, vs1_all, vsh1_all, vw2_all, vs2_all, vsh2_all,
                   dw_all, db_pad)

    in_specs = [pl.BlockSpec(memory_space=pltpu.MemorySpace.SMEM)]
    in_specs += [_full_spec(a.shape) for a in tensor_args]

    out_pad = pl.pallas_call(
        functools.partial(_net_fused_kernel, num_layers=L),
        out_shape=jax.ShapeDtypeStruct((Bp, Tp), jnp.float32),
        grid=(1,),
        in_specs=in_specs,
        out_specs=_full_spec((Bp, Tp)),
        compiler_params=pltpu.CompilerParams(dimension_semantics=("arbitrary",)),
    )(one_plus_eps, *tensor_args)

    return out_pad[:num_graphs, :n_tasks]


# ---------------------------------------------------------------------------
# Main
# ---------------------------------------------------------------------------

if __name__ == "__main__":
    key = jax.random.PRNGKey(0)
    D = 32            # emb_dim
    L = 3             # num_layers
    B = 2             # graphs in the batch
    nodes_per_graph = 8
    num_node_emb_list = [7, 5]
    num_edge_emb_list = [6, 4]
    n_tasks = 1

    N = B * nodes_per_graph
    # Deterministic batched graph: bidirectional ring within each graph.
    src_list, dst_list = [], []
    for g in range(B):
        base = g * nodes_per_graph
        for i in range(nodes_per_graph):
            j = (i + 1) % nodes_per_graph
            src_list += [base + i, base + j]
            dst_list += [base + j, base + i]
    src = jnp.array(src_list, jnp.int32)
    dst = jnp.array(dst_list, jnp.int32)
    E = int(src.shape[0])

    batch_id = jnp.repeat(jnp.arange(B, dtype=jnp.int32), nodes_per_graph)

    # Structural one-hot matrices (graph preprocessing, batch axis padded to 8).
    bcast = jax.nn.one_hot(batch_id, BPAD, dtype=jnp.float32)        # (N, Bp)  vx -> nodes
    psum = bcast.T                                                   # (Bp, N)  sum-pool
    counts = psum.sum(axis=1, keepdims=True)
    inv_count = jnp.where(counts > 0, 1.0 / jnp.maximum(counts, 1.0), 0.0)  # (Bp,1) guard empty
    gsrc = jax.nn.one_hot(src, N, dtype=jnp.float32)                 # (E, N)   gather h[src]
    sdst = jax.nn.one_hot(dst, N, dtype=jnp.float32).T               # (N, E)   scatter to dst
    graph = dict(bcast=bcast, psum=psum, inv_count=inv_count, gsrc=gsrc, sdst=sdst)

    kx, kw, kp = jax.random.split(key, 3)
    x_cat = jnp.stack(
        [jax.random.randint(kx, (N,), 0, num_node_emb_list[0]),
         jax.random.randint(jax.random.fold_in(kx, 1), (N,), 0, num_node_emb_list[1])],
        axis=-1).astype(jnp.int32)
    w_cat = jnp.stack(
        [jax.random.randint(kw, (E,), 0, num_edge_emb_list[0]),
         jax.random.randint(jax.random.fold_in(kw, 1), (E,), 0, num_edge_emb_list[1])],
        axis=-1).astype(jnp.int32)

    params = init_params(kp, num_node_emb_list, num_edge_emb_list, D, L, n_tasks)

    out = net_forward(params, graph, x_cat, w_cat, num_graphs=B)
    out = jax.block_until_ready(out)
    assert out.shape == (B, n_tasks), out.shape
    assert bool(jnp.all(jnp.isfinite(out)))
    print("KERNEL_OK")
</pallas_src>

<mosaic_0001>
module attributes {stable_mosaic.version = 11 : i64} {
  func.func @_net_fused_kernel(%arg0: i32, %arg1: memref<3xf32, #tpu.memory_space<smem>>, %arg2: memref<16x128xf32, #tpu.memory_space<vmem>>, %arg3: memref<16x8xf32, #tpu.memory_space<vmem>>, %arg4: memref<32x16xbf16, #tpu.memory_space<vmem>>, %arg5: memref<16x32xbf16, #tpu.memory_space<vmem>>, %arg6: memref<8x16xbf16, #tpu.memory_space<vmem>>, %arg7: memref<8x1xf32, #tpu.memory_space<vmem>>, %arg8: memref<3x32x128xbf16, #tpu.memory_space<vmem>>, %arg9: memref<3x128x128xbf16, #tpu.memory_space<vmem>>, %arg10: memref<3x1x128xf32, #tpu.memory_space<vmem>>, %arg11: memref<3x1x128xf32, #tpu.memory_space<vmem>>, %arg12: memref<3x128x128xbf16, #tpu.memory_space<vmem>>, %arg13: memref<3x1x128xf32, #tpu.memory_space<vmem>>, %arg14: memref<3x1x128xf32, #tpu.memory_space<vmem>>, %arg15: memref<3x128x128xbf16, #tpu.memory_space<vmem>>, %arg16: memref<3x1x128xf32, #tpu.memory_space<vmem>>, %arg17: memref<3x1x128xf32, #tpu.memory_space<vmem>>, %arg18: memref<3x128x128xbf16, #tpu.memory_space<vmem>>, %arg19: memref<3x1x128xf32, #tpu.memory_space<vmem>>, %arg20: memref<3x1x128xf32, #tpu.memory_space<vmem>>, %arg21: memref<3x128x128xbf16, #tpu.memory_space<vmem>>, %arg22: memref<1x128xf32, #tpu.memory_space<vmem>>, %arg23: memref<8x128xf32, #tpu.memory_space<vmem>>) attributes {dimension_semantics = [#tpu.dimension_semantics<arbitrary>], iteration_bounds = array<i64: 1>, scalar_prefetch = 0 : i64, scratch_operands = 0 : i64, tpu.core_type = #tpu.core_type<tc>, window_params = [{transform_indices = @transform_0, window_bounds = array<i64: 3>}, {pipeline_mode = #tpu.pipeline_mode<synchronous>, transform_indices = @transform_1, window_bounds = array<i64: 16, 128>}, {pipeline_mode = #tpu.pipeline_mode<synchronous>, transform_indices = @transform_2, window_bounds = array<i64: 16, 8>}, {pipeline_mode = #tpu.pipeline_mode<synchronous>, transform_indices = @transform_3, window_bounds = array<i64: 32, 16>}, {pipeline_mode = #tpu.pipeline_mode<synchronous>, transform_indices = @transform_4, window_bounds = array<i64: 16, 32>}, {pipeline_mode = #tpu.pipeline_mode<synchronous>, transform_indices = @transform_5, window_bounds = array<i64: 8, 16>}, {pipeline_mode = #tpu.pipeline_mode<synchronous>, transform_indices = @transform_6, window_bounds = array<i64: 8, 1>}, {pipeline_mode = #tpu.pipeline_mode<synchronous>, transform_indices = @transform_7, window_bounds = array<i64: 3, 32, 128>}, {pipeline_mode = #tpu.pipeline_mode<synchronous>, transform_indices = @transform_8, window_bounds = array<i64: 3, 128, 128>}, {pipeline_mode = #tpu.pipeline_mode<synchronous>, transform_indices = @transform_9, window_bounds = array<i64: 3, 1, 128>}, {pipeline_mode = #tpu.pipeline_mode<synchronous>, transform_indices = @transform_10, window_bounds = array<i64: 3, 1, 128>}, {pipeline_mode = #tpu.pipeline_mode<synchronous>, transform_indices = @transform_11, window_bounds = array<i64: 3, 128, 128>}, {pipeline_mode = #tpu.pipeline_mode<synchronous>, transform_indices = @transform_12, window_bounds = array<i64: 3, 1, 128>}, {pipeline_mode = #tpu.pipeline_mode<synchronous>, transform_indices = @transform_13, window_bounds = array<i64: 3, 1, 128>}, {pipeline_mode = #tpu.pipeline_mode<synchronous>, transform_indices = @transform_14, window_bounds = array<i64: 3, 128, 128>}, {pipeline_mode = #tpu.pipeline_mode<synchronous>, transform_indices = @transform_15, window_bounds = array<i64: 3, 1, 128>}, {pipeline_mode = #tpu.pipeline_mode<synchronous>, transform_indices = @transform_16, window_bounds = array<i64: 3, 1, 128>}, {pipeline_mode = #tpu.pipeline_mode<synchronous>, transform_indices = @transform_17, window_bounds = array<i64: 3, 128, 128>}, {pipeline_mode = #tpu.pipeline_mode<synchronous>, transform_indices = @transform_18, window_bounds = array<i64: 3, 1, 128>}, {pipeline_mode = #tpu.pipeline_mode<synchronous>, transform_indices = @transform_19, window_bounds = array<i64: 3, 1, 128>}, {pipeline_mode = #tpu.pipeline_mode<synchronous>, transform_indices = @transform_20, window_bounds = array<i64: 3, 128, 128>}, {pipeline_mode = #tpu.pipeline_mode<synchronous>, transform_indices = @transform_21, window_bounds = array<i64: 1, 128>}, {pipeline_mode = #tpu.pipeline_mode<synchronous>, transform_indices = @transform_22, window_bounds = array<i64: 8, 128>}]} {
    %c0 = arith.constant 0 : index
    %c0_0 = arith.constant 0 : index
    %0 = vector.load %arg2[%c0, %c0_0] : memref<16x128xf32, #tpu.memory_space<vmem>>, vector<16x128xf32>
    %c0_1 = arith.constant 0 : index
    %c0_2 = arith.constant 0 : index
    %1 = vector.load %arg3[%c0_1, %c0_2] : memref<16x8xf32, #tpu.memory_space<vmem>>, vector<16x8xf32>
    %c0_3 = arith.constant 0 : index
    %c0_4 = arith.constant 0 : index
    %2 = vector.load %arg4[%c0_3, %c0_4] : memref<32x16xbf16, #tpu.memory_space<vmem>>, vector<32x16xbf16>
    %c0_5 = arith.constant 0 : index
    %c0_6 = arith.constant 0 : index
    %3 = vector.load %arg5[%c0_5, %c0_6] : memref<16x32xbf16, #tpu.memory_space<vmem>>, vector<16x32xbf16>
    %c0_7 = arith.constant 0 : index
    %c0_8 = arith.constant 0 : index
    %4 = vector.load %arg6[%c0_7, %c0_8] : memref<8x16xbf16, #tpu.memory_space<vmem>>, vector<8x16xbf16>
    %c0_9 = arith.constant 0 : index
    %c0_10 = arith.constant 0 : index
    %5 = vector.load %arg7[%c0_9, %c0_10] : memref<8x1xf32, #tpu.memory_space<vmem>>, vector<8x1xf32>
    %cst = arith.constant 0.000000e+00 : f32
    %6 = vector.broadcast %cst : f32 to vector<8x128xf32>
    %cst_11 = arith.constant 0.000000e+00 : f32
    %7 = vector.broadcast %cst_11 : f32 to vector<8x128xf32>
    %cst_12 = arith.constant dense<0.000000e+00> : vector<16x128xf32>
    %8 = tpu.matmul %1, %6, %cst_12 {dimension_numbers = #tpu.dot_dimension_numbers<[1], [0], [0], [1], [0, 0, 1, 1], [], []>} : vector<16x8xf32>, vector<8x128xf32>, vector<16x128xf32> -> vector<16x128xf32>
    %9 = arith.addf %0, %8 : vector<16x128xf32>
    %10 = arith.truncf %9 : vector<16x128xf32> to vector<16x128xbf16>
    %cst_13 = arith.constant dense<0.000000e+00> : vector<32x128xf32>
    %11 = tpu.matmul %2, %10, %cst_13 {dimension_numbers = #tpu.dot_dimension_numbers<[1], [0], [0], [1], [0, 0, 1, 1], [], []>} : vector<32x16xbf16>, vector<16x128xbf16>, vector<32x128xf32> -> vector<32x128xf32>
    %c0_14 = arith.constant 0 : index
    %c0_15 = arith.constant 0 : index
    %c0_16 = arith.constant 0 : index
    %12 = vector.load %arg8[%c0_14, %c0_15, %c0_16] : memref<3x32x128xbf16, #tpu.memory_space<vmem>>, vector<1x32x128xbf16>
    %13 = vector.shape_cast %12 : vector<1x32x128xbf16> to vector<32x128xbf16>
    %14 = arith.extf %13 : vector<32x128xbf16> to vector<32x128xf32>
    %15 = arith.addf %11, %14 : vector<32x128xf32>
    %cst_17 = arith.constant 0.000000e+00 : f32
    %16 = vector.broadcast %cst_17 : f32 to vector<32x128xf32>
    %17 = arith.maximumf %15, %16 : vector<32x128xf32>
    %18 = arith.truncf %17 : vector<32x128xf32> to vector<32x128xbf16>
    %cst_18 = arith.constant dense<0.000000e+00> : vector<16x128xf32>
    %19 = tpu.matmul %3, %18, %cst_18 {dimension_numbers = #tpu.dot_dimension_numbers<[1], [0], [0], [1], [0, 0, 1, 1], [], []>} : vector<16x32xbf16>, vector<32x128xbf16>, vector<16x128xf32> -> vector<16x128xf32>
    %c0_19 = arith.constant 0 : index
    %20 = memref.load %arg1[%c0_19] : memref<3xf32, #tpu.memory_space<smem>>
    %21 = vector.broadcast %20 : f32 to vector<16x128xf32>
    %22 = arith.mulf %21, %9 : vector<16x128xf32>
    %23 = arith.addf %22, %19 : vector<16x128xf32>
    %24 = arith.truncf %23 : vector<16x128xf32> to vector<16x128xbf16>
    %c0_20 = arith.constant 0 : index
    %c0_21 = arith.constant 0 : index
    %c0_22 = arith.constant 0 : index
    %25 = vector.load %arg9[%c0_20, %c0_21, %c0_22] : memref<3x128x128xbf16, #tpu.memory_space<vmem>>, vector<1x128x128xbf16>
    %26 = vector.shape_cast %25 : vector<1x128x128xbf16> to vector<128x128xbf16>
    %cst_23 = arith.constant dense<0.000000e+00> : vector<16x128xf32>
    %27 = tpu.matmul %24, %26, %cst_23 {dimension_numbers = #tpu.dot_dimension_numbers<[1], [0], [0], [1], [0, 0, 1, 1], [], []>} : vector<16x128xbf16>, vector<128x128xbf16>, vector<16x128xf32> -> vector<16x128xf32>
    %c0_24 = arith.constant 0 : index
    %c0_25 = arith.constant 0 : index
    %c0_26 = arith.constant 0 : index
    %28 = vector.load %arg10[%c0_24, %c0_25, %c0_26] : memref<3x1x128xf32, #tpu.memory_space<vmem>>, vector<1x1x128xf32>
    %29 = vector.shape_cast %28 : vector<1x1x128xf32> to vector<1x128xf32>
    %30 = vector.broadcast %29 : vector<1x128xf32> to vector<16x128xf32>
    %31 = arith.mulf %27, %30 : vector<16x128xf32>
    %c0_27 = arith.constant 0 : index
    %c0_28 = arith.constant 0 : index
    %c0_29 = arith.constant 0 : index
    %32 = vector.load %arg11[%c0_27, %c0_28, %c0_29] : memref<3x1x128xf32, #tpu.memory_space<vmem>>, vector<1x1x128xf32>
    %33 = vector.shape_cast %32 : vector<1x1x128xf32> to vector<1x128xf32>
    %34 = vector.broadcast %33 : vector<1x128xf32> to vector<16x128xf32>
    %35 = arith.addf %31, %34 : vector<16x128xf32>
    %cst_30 = arith.constant 0.000000e+00 : f32
    %36 = vector.broadcast %cst_30 : f32 to vector<16x128xf32>
    %37 = arith.maximumf %35, %36 : vector<16x128xf32>
    %38 = arith.truncf %37 : vector<16x128xf32> to vector<16x128xbf16>
    %c0_31 = arith.constant 0 : index
    %c0_32 = arith.constant 0 : index
    %c0_33 = arith.constant 0 : index
    %39 = vector.load %arg12[%c0_31, %c0_32, %c0_33] : memref<3x128x128xbf16, #tpu.memory_space<vmem>>, vector<1x128x128xbf16>
    %40 = vector.shape_cast %39 : vector<1x128x128xbf16> to vector<128x128xbf16>
    %cst_34 = arith.constant dense<0.000000e+00> : vector<16x128xf32>
    %41 = tpu.matmul %38, %40, %cst_34 {dimension_numbers = #tpu.dot_dimension_numbers<[1], [0], [0], [1], [0, 0, 1, 1], [], []>} : vector<16x128xbf16>, vector<128x128xbf16>, vector<16x128xf32> -> vector<16x128xf32>
    %c0_35 = arith.constant 0 : index
    %c0_36 = arith.constant 0 : index
    %c0_37 = arith.constant 0 : index
    %42 = vector.load %arg13[%c0_35, %c0_36, %c0_37] : memref<3x1x128xf32, #tpu.memory_space<vmem>>, vector<1x1x128xf32>
    %43 = vector.shape_cast %42 : vector<1x1x128xf32> to vector<1x128xf32>
    %44 = vector.broadcast %43 : vector<1x128xf32> to vector<16x128xf32>
    %45 = arith.mulf %41, %44 : vector<16x128xf32>
    %c0_38 = arith.constant 0 : index
    %c0_39 = arith.constant 0 : index
    %c0_40 = arith.constant 0 : index
    %46 = vector.load %arg14[%c0_38, %c0_39, %c0_40] : memref<3x1x128xf32, #tpu.memory_space<vmem>>, vector<1x1x128xf32>
    %47 = vector.shape_cast %46 : vector<1x1x128xf32> to vector<1x128xf32>
    %48 = vector.broadcast %47 : vector<1x128xf32> to vector<16x128xf32>
    %49 = arith.addf %45, %48 : vector<16x128xf32>
    %cst_41 = arith.constant 0.000000e+00 : f32
    %50 = vector.broadcast %cst_41 : f32 to vector<16x128xf32>
    %51 = arith.maximumf %49, %50 : vector<16x128xf32>
    %52 = arith.truncf %51 : vector<16x128xf32> to vector<16x128xbf16>
    %cst_42 = arith.constant dense<0.000000e+00> : vector<8x128xf32>
    %53 = tpu.matmul %4, %52, %cst_42 {dimension_numbers = #tpu.dot_dimension_numbers<[1], [0], [0], [1], [0, 0, 1, 1], [], []>} : vector<8x16xbf16>, vector<16x128xbf16>, vector<8x128xf32> -> vector<8x128xf32>
    %54 = vector.broadcast %5 : vector<8x1xf32> to vector<8x128xf32>
    %55 = arith.mulf %53, %54 : vector<8x128xf32>
    %56 = arith.truncf %55 : vector<8x128xf32> to vector<8x128xbf16>
    %c0_43 = arith.constant 0 : index
    %c0_44 = arith.constant 0 : index
    %c0_45 = arith.constant 0 : index
    %57 = vector.load %arg21[%c0_43, %c0_44, %c0_45] : memref<3x128x128xbf16, #tpu.memory_space<vmem>>, vector<1x128x128xbf16>
    %58 = vector.shape_cast %57 : vector<1x128x128xbf16> to vector<128x128xbf16>
    %cst_46 = arith.constant dense<0.000000e+00> : vector<8x128xf32>
    %59 = tpu.matmul %56, %58, %cst_46 {dimension_numbers = #tpu.dot_dimension_numbers<[1], [0], [0], [1], [0, 0, 1, 1], [], []>} : vector<8x128xbf16>, vector<128x128xbf16>, vector<8x128xf32> -> vector<8x128xf32>
    %60 = arith.addf %7, %59 : vector<8x128xf32>
    %61 = arith.addf %53, %6 : vector<8x128xf32>
    %62 = arith.truncf %61 : vector<8x128xf32> to vector<8x128xbf16>
    %c0_47 = arith.constant 0 : index
    %c0_48 = arith.constant 0 : index
    %c0_49 = arith.constant 0 : index
    %63 = vector.load %arg15[%c0_47, %c0_48, %c0_49] : memref<3x128x128xbf16, #tpu.memory_space<vmem>>, vector<1x128x128xbf16>
    %64 = vector.shape_cast %63 : vector<1x128x128xbf16> to vector<128x128xbf16>
    %cst_50 = arith.constant dense<0.000000e+00> : vector<8x128xf32>
    %65 = tpu.matmul %62, %64, %cst_50 {dimension_numbers = #tpu.dot_dimension_numbers<[1], [0], [0], [1], [0, 0, 1, 1], [], []>} : vector<8x128xbf16>, vector<128x128xbf16>, vector<8x128xf32> -> vector<8x128xf32>
    %c0_51 = arith.constant 0 : index
    %c0_52 = arith.constant 0 : index
    %c0_53 = arith.constant 0 : index
    %66 = vector.load %arg16[%c0_51, %c0_52, %c0_53] : memref<3x1x128xf32, #tpu.memory_space<vmem>>, vector<1x1x128xf32>
    %67 = vector.shape_cast %66 : vector<1x1x128xf32> to vector<1x128xf32>
    %68 = vector.broadcast %67 : vector<1x128xf32> to vector<8x128xf32>
    %69 = arith.mulf %65, %68 : vector<8x128xf32>
    %c0_54 = arith.constant 0 : index
    %c0_55 = arith.constant 0 : index
    %c0_56 = arith.constant 0 : index
    %70 = vector.load %arg17[%c0_54, %c0_55, %c0_56] : memref<3x1x128xf32, #tpu.memory_space<vmem>>, vector<1x1x128xf32>
    %71 = vector.shape_cast %70 : vector<1x1x128xf32> to vector<1x128xf32>
    %72 = vector.broadcast %71 : vector<1x128xf32> to vector<8x128xf32>
    %73 = arith.addf %69, %72 : vector<8x128xf32>
    %cst_57 = arith.constant 0.000000e+00 : f32
    %74 = vector.broadcast %cst_57 : f32 to vector<8x128xf32>
    %75 = arith.maximumf %73, %74 : vector<8x128xf32>
    %76 = arith.truncf %75 : vector<8x128xf32> to vector<8x128xbf16>
    %c0_58 = arith.constant 0 : index
    %c0_59 = arith.constant 0 : index
    %c0_60 = arith.constant 0 : index
    %77 = vector.load %arg18[%c0_58, %c0_59, %c0_60] : memref<3x128x128xbf16, #tpu.memory_space<vmem>>, vector<1x128x128xbf16>
    %78 = vector.shape_cast %77 : vector<1x128x128xbf16> to vector<128x128xbf16>
    %cst_61 = arith.constant dense<0.000000e+00> : vector<8x128xf32>
    %79 = tpu.matmul %76, %78, %cst_61 {dimension_numbers = #tpu.dot_dimension_numbers<[1], [0], [0], [1], [0, 0, 1, 1], [], []>} : vector<8x128xbf16>, vector<128x128xbf16>, vector<8x128xf32> -> vector<8x128xf32>
    %c0_62 = arith.constant 0 : index
    %c0_63 = arith.constant 0 : index
    %c0_64 = arith.constant 0 : index
    %80 = vector.load %arg19[%c0_62, %c0_63, %c0_64] : memref<3x1x128xf32, #tpu.memory_space<vmem>>, vector<1x1x128xf32>
    %81 = vector.shape_cast %80 : vector<1x1x128xf32> to vector<1x128xf32>
    %82 = vector.broadcast %81 : vector<1x128xf32> to vector<8x128xf32>
    %83 = arith.mulf %79, %82 : vector<8x128xf32>
    %c0_65 = arith.constant 0 : index
    %c0_66 = arith.constant 0 : index
    %c0_67 = arith.constant 0 : index
    %84 = vector.load %arg20[%c0_65, %c0_66, %c0_67] : memref<3x1x128xf32, #tpu.memory_space<vmem>>, vector<1x1x128xf32>
    %85 = vector.shape_cast %84 : vector<1x1x128xf32> to vector<1x128xf32>
    %86 = vector.broadcast %85 : vector<1x128xf32> to vector<8x128xf32>
    %87 = arith.addf %83, %86 : vector<8x128xf32>
    %cst_68 = arith.constant 0.000000e+00 : f32
    %88 = vector.broadcast %cst_68 : f32 to vector<8x128xf32>
    %89 = arith.maximumf %87, %88 : vector<8x128xf32>
    %90 = arith.addf %6, %89 : vector<8x128xf32>
    %cst_69 = arith.constant dense<0.000000e+00> : vector<16x128xf32>
    %91 = tpu.matmul %1, %90, %cst_69 {dimension_numbers = #tpu.dot_dimension_numbers<[1], [0], [0], [1], [0, 0, 1, 1], [], []>} : vector<16x8xf32>, vector<8x128xf32>, vector<16x128xf32> -> vector<16x128xf32>
    %92 = arith.addf %51, %91 : vector<16x128xf32>
    %93 = arith.truncf %92 : vector<16x128xf32> to vector<16x128xbf16>
    %cst_70 = arith.constant dense<0.000000e+00> : vector<32x128xf32>
    %94 = tpu.matmul %2, %93, %cst_70 {dimension_numbers = #tpu.dot_dimension_numbers<[1], [0], [0], [1], [0, 0, 1, 1], [], []>} : vector<32x16xbf16>, vector<16x128xbf16>, vector<32x128xf32> -> vector<32x128xf32>
    %c1 = arith.constant 1 : index
    %c0_71 = arith.constant 0 : index
    %c0_72 = arith.constant 0 : index
    %95 = vector.load %arg8[%c1, %c0_71, %c0_72] : memref<3x32x128xbf16, #tpu.memory_space<vmem>>, vector<1x32x128xbf16>
    %96 = vector.shape_cast %95 : vector<1x32x128xbf16> to vector<32x128xbf16>
    %97 = arith.extf %96 : vector<32x128xbf16> to vector<32x128xf32>
    %98 = arith.addf %94, %97 : vector<32x128xf32>
    %cst_73 = arith.constant 0.000000e+00 : f32
    %99 = vector.broadcast %cst_73 : f32 to vector<32x128xf32>
    %100 = arith.maximumf %98, %99 : vector<32x128xf32>
    %101 = arith.truncf %100 : vector<32x128xf32> to vector<32x128xbf16>
    %cst_74 = arith.constant dense<0.000000e+00> : vector<16x128xf32>
    %102 = tpu.matmul %3, %101, %cst_74 {dimension_numbers = #tpu.dot_dimension_numbers<[1], [0], [0], [1], [0, 0, 1, 1], [], []>} : vector<16x32xbf16>, vector<32x128xbf16>, vector<16x128xf32> -> vector<16x128xf32>
    %c1_75 = arith.constant 1 : index
    %103 = memref.load %arg1[%c1_75] : memref<3xf32, #tpu.memory_space<smem>>
    %104 = vector.broadcast %103 : f32 to vector<16x128xf32>
    %105 = arith.mulf %104, %92 : vector<16x128xf32>
    %106 = arith.addf %105, %102 : vector<16x128xf32>
    %107 = arith.truncf %106 : vector<16x128xf32> to vector<16x128xbf16>
    %c1_76 = arith.constant 1 : index
    %c0_77 = arith.constant 0 : index
    %c0_78 = arith.constant 0 : index
    %108 = vector.load %arg9[%c1_76, %c0_77, %c0_78] : memref<3x128x128xbf16, #tpu.memory_space<vmem>>, vector<1x128x128xbf16>
    %109 = vector.shape_cast %108 : vector<1x128x128xbf16> to vector<128x128xbf16>
    %cst_79 = arith.constant dense<0.000000e+00> : vector<16x128xf32>
    %110 = tpu.matmul %107, %109, %cst_79 {dimension_numbers = #tpu.dot_dimension_numbers<[1], [0], [0], [1], [0, 0, 1, 1], [], []>} : vector<16x128xbf16>, vector<128x128xbf16>, vector<16x128xf32> -> vector<16x128xf32>
    %c1_80 = arith.constant 1 : index
    %c0_81 = arith.constant 0 : index
    %c0_82 = arith.constant 0 : index
    %111 = vector.load %arg10[%c1_80, %c0_81, %c0_82] : memref<3x1x128xf32, #tpu.memory_space<vmem>>, vector<1x1x128xf32>
    %112 = vector.shape_cast %111 : vector<1x1x128xf32> to vector<1x128xf32>
    %113 = vector.broadcast %112 : vector<1x128xf32> to vector<16x128xf32>
    %114 = arith.mulf %110, %113 : vector<16x128xf32>
    %c1_83 = arith.constant 1 : index
    %c0_84 = arith.constant 0 : index
    %c0_85 = arith.constant 0 : index
    %115 = vector.load %arg11[%c1_83, %c0_84, %c0_85] : memref<3x1x128xf32, #tpu.memory_space<vmem>>, vector<1x1x128xf32>
    %116 = vector.shape_cast %115 : vector<1x1x128xf32> to vector<1x128xf32>
    %117 = vector.broadcast %116 : vector<1x128xf32> to vector<16x128xf32>
    %118 = arith.addf %114, %117 : vector<16x128xf32>
    %cst_86 = arith.constant 0.000000e+00 : f32
    %119 = vector.broadcast %cst_86 : f32 to vector<16x128xf32>
    %120 = arith.maximumf %118, %119 : vector<16x128xf32>
    %121 = arith.truncf %120 : vector<16x128xf32> to vector<16x128xbf16>
    %c1_87 = arith.constant 1 : index
    %c0_88 = arith.constant 0 : index
    %c0_89 = arith.constant 0 : index
    %122 = vector.load %arg12[%c1_87, %c0_88, %c0_89] : memref<3x128x128xbf16, #tpu.memory_space<vmem>>, vector<1x128x128xbf16>
    %123 = vector.shape_cast %122 : vector<1x128x128xbf16> to vector<128x128xbf16>
    %cst_90 = arith.constant dense<0.000000e+00> : vector<16x128xf32>
    %124 = tpu.matmul %121, %123, %cst_90 {dimension_numbers = #tpu.dot_dimension_numbers<[1], [0], [0], [1], [0, 0, 1, 1], [], []>} : vector<16x128xbf16>, vector<128x128xbf16>, vector<16x128xf32> -> vector<16x128xf32>
    %c1_91 = arith.constant 1 : index
    %c0_92 = arith.constant 0 : index
    %c0_93 = arith.constant 0 : index
    %125 = vector.load %arg13[%c1_91, %c0_92, %c0_93] : memref<3x1x128xf32, #tpu.memory_space<vmem>>, vector<1x1x128xf32>
    %126 = vector.shape_cast %125 : vector<1x1x128xf32> to vector<1x128xf32>
    %127 = vector.broadcast %126 : vector<1x128xf32> to vector<16x128xf32>
    %128 = arith.mulf %124, %127 : vector<16x128xf32>
    %c1_94 = arith.constant 1 : index
    %c0_95 = arith.constant 0 : index
    %c0_96 = arith.constant 0 : index
    %129 = vector.load %arg14[%c1_94, %c0_95, %c0_96] : memref<3x1x128xf32, #tpu.memory_space<vmem>>, vector<1x1x128xf32>
    %130 = vector.shape_cast %129 : vector<1x1x128xf32> to vector<1x128xf32>
    %131 = vector.broadcast %130 : vector<1x128xf32> to vector<16x128xf32>
    %132 = arith.addf %128, %131 : vector<16x128xf32>
    %cst_97 = arith.constant 0.000000e+00 : f32
    %133 = vector.broadcast %cst_97 : f32 to vector<16x128xf32>
    %134 = arith.maximumf %132, %133 : vector<16x128xf32>
    %135 = arith.truncf %134 : vector<16x128xf32> to vector<16x128xbf16>
    %cst_98 = arith.constant dense<0.000000e+00> : vector<8x128xf32>
    %136 = tpu.matmul %4, %135, %cst_98 {dimension_numbers = #tpu.dot_dimension_numbers<[1], [0], [0], [1], [0, 0, 1, 1], [], []>} : vector<8x16xbf16>, vector<16x128xbf16>, vector<8x128xf32> -> vector<8x128xf32>
    %137 = vector.broadcast %5 : vector<8x1xf32> to vector<8x128xf32>
    %138 = arith.mulf %136, %137 : vector<8x128xf32>
    %139 = arith.truncf %138 : vector<8x128xf32> to vector<8x128xbf16>
    %c1_99 = arith.constant 1 : index
    %c0_100 = arith.constant 0 : index
    %c0_101 = arith.constant 0 : index
    %140 = vector.load %arg21[%c1_99, %c0_100, %c0_101] : memref<3x128x128xbf16, #tpu.memory_space<vmem>>, vector<1x128x128xbf16>
    %141 = vector.shape_cast %140 : vector<1x128x128xbf16> to vector<128x128xbf16>
    %cst_102 = arith.constant dense<0.000000e+00> : vector<8x128xf32>
    %142 = tpu.matmul %139, %141, %cst_102 {dimension_numbers = #tpu.dot_dimension_numbers<[1], [0], [0], [1], [0, 0, 1, 1], [], []>} : vector<8x128xbf16>, vector<128x128xbf16>, vector<8x128xf32> -> vector<8x128xf32>
    %143 = arith.addf %60, %142 : vector<8x128xf32>
    %144 = arith.addf %136, %90 : vector<8x128xf32>
    %145 = arith.truncf %144 : vector<8x128xf32> to vector<8x128xbf16>
    %c1_103 = arith.constant 1 : index
    %c0_104 = arith.constant 0 : index
    %c0_105 = arith.constant 0 : index
    %146 = vector.load %arg15[%c1_103, %c0_104, %c0_105] : memref<3x128x128xbf16, #tpu.memory_space<vmem>>, vector<1x128x128xbf16>
    %147 = vector.shape_cast %146 : vector<1x128x128xbf16> to vector<128x128xbf16>
    %cst_106 = arith.constant dense<0.000000e+00> : vector<8x128xf32>
    %148 = tpu.matmul %145, %147, %cst_106 {dimension_numbers = #tpu.dot_dimension_numbers<[1], [0], [0], [1], [0, 0, 1, 1], [], []>} : vector<8x128xbf16>, vector<128x128xbf16>, vector<8x128xf32> -> vector<8x128xf32>
    %c1_107 = arith.constant 1 : index
    %c0_108 = arith.constant 0 : index
    %c0_109 = arith.constant 0 : index
    %149 = vector.load %arg16[%c1_107, %c0_108, %c0_109] : memref<3x1x128xf32, #tpu.memory_space<vmem>>, vector<1x1x128xf32>
    %150 = vector.shape_cast %149 : vector<1x1x128xf32> to vector<1x128xf32>
    %151 = vector.broadcast %150 : vector<1x128xf32> to vector<8x128xf32>
    %152 = arith.mulf %148, %151 : vector<8x128xf32>
    %c1_110 = arith.constant 1 : index
    %c0_111 = arith.constant 0 : index
    %c0_112 = arith.constant 0 : index
    %153 = vector.load %arg17[%c1_110, %c0_111, %c0_112] : memref<3x1x128xf32, #tpu.memory_space<vmem>>, vector<1x1x128xf32>
    %154 = vector.shape_cast %153 : vector<1x1x128xf32> to vector<1x128xf32>
    %155 = vector.broadcast %154 : vector<1x128xf32> to vector<8x128xf32>
    %156 = arith.addf %152, %155 : vector<8x128xf32>
    %cst_113 = arith.constant 0.000000e+00 : f32
    %157 = vector.broadcast %cst_113 : f32 to vector<8x128xf32>
    %158 = arith.maximumf %156, %157 : vector<8x128xf32>
    %159 = arith.truncf %158 : vector<8x128xf32> to vector<8x128xbf16>
    %c1_114 = arith.constant 1 : index
    %c0_115 = arith.constant 0 : index
    %c0_116 = arith.constant 0 : index
    %160 = vector.load %arg18[%c1_114, %c0_115, %c0_116] : memref<3x128x128xbf16, #tpu.memory_space<vmem>>, vector<1x128x128xbf16>
    %161 = vector.shape_cast %160 : vector<1x128x128xbf16> to vector<128x128xbf16>
    %cst_117 = arith.constant dense<0.000000e+00> : vector<8x128xf32>
    %162 = tpu.matmul %159, %161, %cst_117 {dimension_numbers = #tpu.dot_dimension_numbers<[1], [0], [0], [1], [0, 0, 1, 1], [], []>} : vector<8x128xbf16>, vector<128x128xbf16>, vector<8x128xf32> -> vector<8x128xf32>
    %c1_118 = arith.constant 1 : index
    %c0_119 = arith.constant 0 : index
    %c0_120 = arith.constant 0 : index
    %163 = vector.load %arg19[%c1_118, %c0_119, %c0_120] : memref<3x1x128xf32, #tpu.memory_space<vmem>>, vector<1x1x128xf32>
    %164 = vector.shape_cast %163 : vector<1x1x128xf32> to vector<1x128xf32>
    %165 = vector.broadcast %164 : vector<1x128xf32> to vector<8x128xf32>
    %166 = arith.mulf %162, %165 : vector<8x128xf32>
    %c1_121 = arith.constant 1 : index
    %c0_122 = arith.constant 0 : index
    %c0_123 = arith.constant 0 : index
    %167 = vector.load %arg20[%c1_121, %c0_122, %c0_123] : memref<3x1x128xf32, #tpu.memory_space<vmem>>, vector<1x1x128xf32>
    %168 = vector.shape_cast %167 : vector<1x1x128xf32> to vector<1x128xf32>
    %169 = vector.broadcast %168 : vector<1x128xf32> to vector<8x128xf32>
    %170 = arith.addf %166, %169 : vector<8x128xf32>
    %cst_124 = arith.constant 0.000000e+00 : f32
    %171 = vector.broadcast %cst_124 : f32 to vector<8x128xf32>
    %172 = arith.maximumf %170, %171 : vector<8x128xf32>
    %173 = arith.addf %90, %172 : vector<8x128xf32>
    %cst_125 = arith.constant dense<0.000000e+00> : vector<16x128xf32>
    %174 = tpu.matmul %1, %173, %cst_125 {dimension_numbers = #tpu.dot_dimension_numbers<[1], [0], [0], [1], [0, 0, 1, 1], [], []>} : vector<16x8xf32>, vector<8x128xf32>, vector<16x128xf32> -> vector<16x128xf32>
    %175 = arith.addf %134, %174 : vector<16x128xf32>
    %176 = arith.truncf %175 : vector<16x128xf32> to vector<16x128xbf16>
    %cst_126 = arith.constant dense<0.000000e+00> : vector<32x128xf32>
    %177 = tpu.matmul %2, %176, %cst_126 {dimension_numbers = #tpu.dot_dimension_numbers<[1], [0], [0], [1], [0, 0, 1, 1], [], []>} : vector<32x16xbf16>, vector<16x128xbf16>, vector<32x128xf32> -> vector<32x128xf32>
    %c2 = arith.constant 2 : index
    %c0_127 = arith.constant 0 : index
    %c0_128 = arith.constant 0 : index
    %178 = vector.load %arg8[%c2, %c0_127, %c0_128] : memref<3x32x128xbf16, #tpu.memory_space<vmem>>, vector<1x32x128xbf16>
    %179 = vector.shape_cast %178 : vector<1x32x128xbf16> to vector<32x128xbf16>
    %180 = arith.extf %179 : vector<32x128xbf16> to vector<32x128xf32>
    %181 = arith.addf %177, %180 : vector<32x128xf32>
    %cst_129 = arith.constant 0.000000e+00 : f32
    %182 = vector.broadcast %cst_129 : f32 to vector<32x128xf32>
    %183 = arith.maximumf %181, %182 : vector<32x128xf32>
    %184 = arith.truncf %183 : vector<32x128xf32> to vector<32x128xbf16>
    %cst_130 = arith.constant dense<0.000000e+00> : vector<16x128xf32>
    %185 = tpu.matmul %3, %184, %cst_130 {dimension_numbers = #tpu.dot_dimension_numbers<[1], [0], [0], [1], [0, 0, 1, 1], [], []>} : vector<16x32xbf16>, vector<32x128xbf16>, vector<16x128xf32> -> vector<16x128xf32>
    %c2_131 = arith.constant 2 : index
    %186 = memref.load %arg1[%c2_131] : memref<3xf32, #tpu.memory_space<smem>>
    %187 = vector.broadcast %186 : f32 to vector<16x128xf32>
    %188 = arith.mulf %187, %175 : vector<16x128xf32>
    %189 = arith.addf %188, %185 : vector<16x128xf32>
    %190 = arith.truncf %189 : vector<16x128xf32> to vector<16x128xbf16>
    %c2_132 = arith.constant 2 : index
    %c0_133 = arith.constant 0 : index
    %c0_134 = arith.constant 0 : index
    %191 = vector.load %arg9[%c2_132, %c0_133, %c0_134] : memref<3x128x128xbf16, #tpu.memory_space<vmem>>, vector<1x128x128xbf16>
    %192 = vector.shape_cast %191 : vector<1x128x128xbf16> to vector<128x128xbf16>
    %cst_135 = arith.constant dense<0.000000e+00> : vector<16x128xf32>
    %193 = tpu.matmul %190, %192, %cst_135 {dimension_numbers = #tpu.dot_dimension_numbers<[1], [0], [0], [1], [0, 0, 1, 1], [], []>} : vector<16x128xbf16>, vector<128x128xbf16>, vector<16x128xf32> -> vector<16x128xf32>
    %c2_136 = arith.constant 2 : index
    %c0_137 = arith.constant 0 : index
    %c0_138 = arith.constant 0 : index
    %194 = vector.load %arg10[%c2_136, %c0_137, %c0_138] : memref<3x1x128xf32, #tpu.memory_space<vmem>>, vector<1x1x128xf32>
    %195 = vector.shape_cast %194 : vector<1x1x128xf32> to vector<1x128xf32>
    %196 = vector.broadcast %195 : vector<1x128xf32> to vector<16x128xf32>
    %197 = arith.mulf %193, %196 : vector<16x128xf32>
    %c2_139 = arith.constant 2 : index
    %c0_140 = arith.constant 0 : index
    %c0_141 = arith.constant 0 : index
    %198 = vector.load %arg11[%c2_139, %c0_140, %c0_141] : memref<3x1x128xf32, #tpu.memory_space<vmem>>, vector<1x1x128xf32>
    %199 = vector.shape_cast %198 : vector<1x1x128xf32> to vector<1x128xf32>
    %200 = vector.broadcast %199 : vector<1x128xf32> to vector<16x128xf32>
    %201 = arith.addf %197, %200 : vector<16x128xf32>
    %cst_142 = arith.constant 0.000000e+00 : f32
    %202 = vector.broadcast %cst_142 : f32 to vector<16x128xf32>
    %203 = arith.maximumf %201, %202 : vector<16x128xf32>
    %204 = arith.truncf %203 : vector<16x128xf32> to vector<16x128xbf16>
    %c2_143 = arith.constant 2 : index
    %c0_144 = arith.constant 0 : index
    %c0_145 = arith.constant 0 : index
    %205 = vector.load %arg12[%c2_143, %c0_144, %c0_145] : memref<3x128x128xbf16, #tpu.memory_space<vmem>>, vector<1x128x128xbf16>
    %206 = vector.shape_cast %205 : vector<1x128x128xbf16> to vector<128x128xbf16>
    %cst_146 = arith.constant dense<0.000000e+00> : vector<16x128xf32>
    %207 = tpu.matmul %204, %206, %cst_146 {dimension_numbers = #tpu.dot_dimension_numbers<[1], [0], [0], [1], [0, 0, 1, 1], [], []>} : vector<16x128xbf16>, vector<128x128xbf16>, vector<16x128xf32> -> vector<16x128xf32>
    %c2_147 = arith.constant 2 : index
    %c0_148 = arith.constant 0 : index
    %c0_149 = arith.constant 0 : index
    %208 = vector.load %arg13[%c2_147, %c0_148, %c0_149] : memref<3x1x128xf32, #tpu.memory_space<vmem>>, vector<1x1x128xf32>
    %209 = vector.shape_cast %208 : vector<1x1x128xf32> to vector<1x128xf32>
    %210 = vector.broadcast %209 : vector<1x128xf32> to vector<16x128xf32>
    %211 = arith.mulf %207, %210 : vector<16x128xf32>
    %c2_150 = arith.constant 2 : index
    %c0_151 = arith.constant 0 : index
    %c0_152 = arith.constant 0 : index
    %212 = vector.load %arg14[%c2_150, %c0_151, %c0_152] : memref<3x1x128xf32, #tpu.memory_space<vmem>>, vector<1x1x128xf32>
    %213 = vector.shape_cast %212 : vector<1x1x128xf32> to vector<1x128xf32>
    %214 = vector.broadcast %213 : vector<1x128xf32> to vector<16x128xf32>
    %215 = arith.addf %211, %214 : vector<16x128xf32>
    %216 = arith.truncf %215 : vector<16x128xf32> to vector<16x128xbf16>
    %cst_153 = arith.constant dense<0.000000e+00> : vector<8x128xf32>
    %217 = tpu.matmul %4, %216, %cst_153 {dimension_numbers = #tpu.dot_dimension_numbers<[1], [0], [0], [1], [0, 0, 1, 1], [], []>} : vector<8x16xbf16>, vector<16x128xbf16>, vector<8x128xf32> -> vector<8x128xf32>
    %218 = vector.broadcast %5 : vector<8x1xf32> to vector<8x128xf32>
    %219 = arith.mulf %217, %218 : vector<8x128xf32>
    %220 = arith.truncf %219 : vector<8x128xf32> to vector<8x128xbf16>
    %c2_154 = arith.constant 2 : index
    %c0_155 = arith.constant 0 : index
    %c0_156 = arith.constant 0 : index
    %221 = vector.load %arg21[%c2_154, %c0_155, %c0_156] : memref<3x128x128xbf16, #tpu.memory_space<vmem>>, vector<1x128x128xbf16>
    %222 = vector.shape_cast %221 : vector<1x128x128xbf16> to vector<128x128xbf16>
    %cst_157 = arith.constant dense<0.000000e+00> : vector<8x128xf32>
    %223 = tpu.matmul %220, %222, %cst_157 {dimension_numbers = #tpu.dot_dimension_numbers<[1], [0], [0], [1], [0, 0, 1, 1], [], []>} : vector<8x128xbf16>, vector<128x128xbf16>, vector<8x128xf32> -> vector<8x128xf32>
    %224 = arith.addf %143, %223 : vector<8x128xf32>
    %c0_158 = arith.constant 0 : index
    %c0_159 = arith.constant 0 : index
    %225 = vector.load %arg22[%c0_158, %c0_159] : memref<1x128xf32, #tpu.memory_space<vmem>>, vector<1x128xf32>
    %226 = vector.broadcast %225 : vector<1x128xf32> to vector<8x128xf32>
    %227 = arith.addf %224, %226 : vector<8x128xf32>
    %c0_160 = arith.constant 0 : index
    %c0_161 = arith.constant 0 : index
    %228 = vector.load %arg23[%c0_160, %c0_161] : memref<8x128xf32, #tpu.memory_space<vmem>>, vector<8x128xf32>
    tpu.vector_store %arg23[%c0_160, %c0_161], %227 {strides = array<i32>} : memref<8x128xf32, #tpu.memory_space<vmem>>, vector<8x128xf32>,
    return
  }
  func.func @transform_0(%arg0: i32) -> i32 {
    %c0_i32 = arith.constant 0 : i32
    %c0_i32_0 = arith.constant 0 : i32
    return %c0_i32 : i32
  }
  func.func @transform_1(%arg0: i32) -> (i32, i32) {
    %c0_i32 = arith.constant 0 : i32
    %c0_i32_0 = arith.constant 0 : i32
    %c0_i32_1 = arith.constant 0 : i32
    return %c0_i32, %c0_i32_0 : i32, i32
  }
  func.func @transform_2(%arg0: i32) -> (i32, i32) {
    %c0_i32 = arith.constant 0 : i32
    %c0_i32_0 = arith.constant 0 : i32
    %c0_i32_1 = arith.constant 0 : i32
    return %c0_i32, %c0_i32_0 : i32, i32
  }
  func.func @transform_3(%arg0: i32) -> (i32, i32) {
    %c0_i32 = arith.constant 0 : i32
    %c0_i32_0 = arith.constant 0 : i32
    %c0_i32_1 = arith.constant 0 : i32
    return %c0_i32, %c0_i32_0 : i32, i32
  }
  func.func @transform_4(%arg0: i32) -> (i32, i32) {
    %c0_i32 = arith.constant 0 : i32
    %c0_i32_0 = arith.constant 0 : i32
    %c0_i32_1 = arith.constant 0 : i32
    return %c0_i32, %c0_i32_0 : i32, i32
  }
  func.func @transform_5(%arg0: i32) -> (i32, i32) {
    %c0_i32 = arith.constant 0 : i32
    %c0_i32_0 = arith.constant 0 : i32
    %c0_i32_1 = arith.constant 0 : i32
    return %c0_i32, %c0_i32_0 : i32, i32
  }
  func.func @transform_6(%arg0: i32) -> (i32, i32) {
    %c0_i32 = arith.constant 0 : i32
    %c0_i32_0 = arith.constant 0 : i32
    %c0_i32_1 = arith.constant 0 : i32
    return %c0_i32, %c0_i32_0 : i32, i32
  }
  func.func @transform_7(%arg0: i32) -> (i32, i32, i32) {
    %c0_i32 = arith.constant 0 : i32
    %c0_i32_0 = arith.constant 0 : i32
    %c0_i32_1 = arith.constant 0 : i32
    %c0_i32_2 = arith.constant 0 : i32
    return %c0_i32, %c0_i32_0, %c0_i32_1 : i32, i32, i32
  }
  func.func @transform_8(%arg0: i32) -> (i32, i32, i32) {
    %c0_i32 = arith.constant 0 : i32
    %c0_i32_0 = arith.constant 0 : i32
    %c0_i32_1 = arith.constant 0 : i32
    %c0_i32_2 = arith.constant 0 : i32
    return %c0_i32, %c0_i32_0, %c0_i32_1 : i32, i32, i32
  }
  func.func @transform_9(%arg0: i32) -> (i32, i32, i32) {
    %c0_i32 = arith.constant 0 : i32
    %c0_i32_0 = arith.constant 0 : i32
    %c0_i32_1 = arith.constant 0 : i32
    %c0_i32_2 = arith.constant 0 : i32
    return %c0_i32, %c0_i32_0, %c0_i32_1 : i32, i32, i32
  }
  func.func @transform_10(%arg0: i32) -> (i32, i32, i32) {
    %c0_i32 = arith.constant 0 : i32
    %c0_i32_0 = arith.constant 0 : i32
    %c0_i32_1 = arith.constant 0 : i32
    %c0_i32_2 = arith.constant 0 : i32
    return %c0_i32, %c0_i32_0, %c0_i32_1 : i32, i32, i32
  }
  func.func @transform_11(%arg0: i32) -> (i32, i32, i32) {
    %c0_i32 = arith.constant 0 : i32
    %c0_i32_0 = arith.constant 0 : i32
    %c0_i32_1 = arith.constant 0 : i32
    %c0_i32_2 = arith.constant 0 : i32
    return %c0_i32, %c0_i32_0, %c0_i32_1 : i32, i32, i32
  }
  func.func @transform_12(%arg0: i32) -> (i32, i32, i32) {
    %c0_i32 = arith.constant 0 : i32
    %c0_i32_0 = arith.constant 0 : i32
    %c0_i32_1 = arith.constant 0 : i32
    %c0_i32_2 = arith.constant 0 : i32
    return %c0_i32, %c0_i32_0, %c0_i32_1 : i32, i32, i32
  }
  func.func @transform_13(%arg0: i32) -> (i32, i32, i32) {
    %c0_i32 = arith.constant 0 : i32
    %c0_i32_0 = arith.constant 0 : i32
    %c0_i32_1 = arith.constant 0 : i32
    %c0_i32_2 = arith.constant 0 : i32
    return %c0_i32, %c0_i32_0, %c0_i32_1 : i32, i32, i32
  }
  func.func @transform_14(%arg0: i32) -> (i32, i32, i32) {
    %c0_i32 = arith.constant 0 : i32
    %c0_i32_0 = arith.constant 0 : i32
    %c0_i32_1 = arith.constant 0 : i32
    %c0_i32_2 = arith.constant 0 : i32
    return %c0_i32, %c0_i32_0, %c0_i32_1 : i32, i32, i32
  }
  func.func @transform_15(%arg0: i32) -> (i32, i32, i32) {
    %c0_i32 = arith.constant 0 : i32
    %c0_i32_0 = arith.constant 0 : i32
    %c0_i32_1 = arith.constant 0 : i32
    %c0_i32_2 = arith.constant 0 : i32
    return %c0_i32, %c0_i32_0, %c0_i32_1 : i32, i32, i32
  }
  func.func @transform_16(%arg0: i32) -> (i32, i32, i32) {
    %c0_i32 = arith.constant 0 : i32
    %c0_i32_0 = arith.constant 0 : i32
    %c0_i32_1 = arith.constant 0 : i32
    %c0_i32_2 = arith.constant 0 : i32
    return %c0_i32, %c0_i32_0, %c0_i32_1 : i32, i32, i32
  }
  func.func @transform_17(%arg0: i32) -> (i32, i32, i32) {
    %c0_i32 = arith.constant 0 : i32
    %c0_i32_0 = arith.constant 0 : i32
    %c0_i32_1 = arith.constant 0 : i32
    %c0_i32_2 = arith.constant 0 : i32
    return %c0_i32, %c0_i32_0, %c0_i32_1 : i32, i32, i32
  }
  func.func @transform_18(%arg0: i32) -> (i32, i32, i32) {
    %c0_i32 = arith.constant 0 : i32
    %c0_i32_0 = arith.constant 0 : i32
    %c0_i32_1 = arith.constant 0 : i32
    %c0_i32_2 = arith.constant 0 : i32
    return %c0_i32, %c0_i32_0, %c0_i32_1 : i32, i32, i32
  }
  func.func @transform_19(%arg0: i32) -> (i32, i32, i32) {
    %c0_i32 = arith.constant 0 : i32
    %c0_i32_0 = arith.constant 0 : i32
    %c0_i32_1 = arith.constant 0 : i32
    %c0_i32_2 = arith.constant 0 : i32
    return %c0_i32, %c0_i32_0, %c0_i32_1 : i32, i32, i32
  }
  func.func @transform_20(%arg0: i32) -> (i32, i32, i32) {
    %c0_i32 = arith.constant 0 : i32
    %c0_i32_0 = arith.constant 0 : i32
    %c0_i32_1 = arith.constant 0 : i32
    %c0_i32_2 = arith.constant 0 : i32
    return %c0_i32, %c0_i32_0, %c0_i32_1 : i32, i32, i32
  }
  func.func @transform_21(%arg0: i32) -> (i32, i32) {
    %c0_i32 = arith.constant 0 : i32
    %c0_i32_0 = arith.constant 0 : i32
    %c0_i32_1 = arith.constant 0 : i32
    return %c0_i32, %c0_i32_0 : i32, i32
  }
  func.func @transform_22(%arg0: i32) -> (i32, i32) {
    %c0_i32 = arith.constant 0 : i32
    %c0_i32_0 = arith.constant 0 : i32
    %c0_i32_1 = arith.constant 0 : i32
    return %c0_i32, %c0_i32_0 : i32, i32
  }
}

</mosaic_0001>

<bundles_post_ra>
// kernel: net_forward.1
= control target key start
LH: loop header
LB: loop body
LE: loop exit
PB: predicated region body
PF: predicated region fallthrough
CT: control target
= control target key end

     0   :  { %s3002_s0 = inlined_call_operand.vmem [shape: f32[3], index: 0, kind: input, shape index: {}]   ;;  %s3003_s1 = inlined_call_operand.vmem [shape: f32[16,128], index: 1, kind: input, shape index: {}]   ;;  %s3004_s2 = inlined_call_operand.vmem [shape: f32[16,8], index: 2, kind: input, shape index: {}]   ;;  %s3005_s3 = inlined_call_operand.vmem [shape: bf16[32,16], index: 3, kind: input, shape index: {}]   ;;  %s3006_s4 = inlined_call_operand.vmem [shape: bf16[16,32], index: 4, kind: input, shape index: {}]   ;;  %s3007_s5 = inlined_call_operand.vmem [shape: bf16[8,16], index: 5, kind: input, shape index: {}]   ;;  %s3008_s6 = inlined_call_operand.vmem [shape: f32[8,1], index: 6, kind: input, shape index: {}]   ;;  %s3009_s7 = inlined_call_operand.vmem [shape: bf16[3,32,128], index: 7, kind: input, shape index: {}]   ;;  %s3010_s8 = inlined_call_operand.vmem [shape: bf16[3,128,128], index: 8, kind: input, shape index: {}]   ;;  %s3011_s9 = inlined_call_operand.vmem [shape: f32[3,1,128], index: 9, kind: input, shape index: {}]   ;;  %s3012_s10 = inlined_call_operand.vmem [shape: f32[3,1,128], index: 10, kind: input, shape index: {}]   ;;  %s3013_s11 = inlined_call_operand.vmem [shape: bf16[3,128,128], index: 11, kind: input, shape index: {}]   ;;  %s3014_s12 = inlined_call_operand.vmem [shape: f32[3,1,128], index: 12, kind: input, shape index: {}]   ;;  %s3015_s13 = inlined_call_operand.vmem [shape: f32[3,1,128], index: 13, kind: input, shape index: {}]   ;;  %s3016_s14 = inlined_call_operand.vmem [shape: bf16[3,128,128], index: 14, kind: input, shape index: {}]   ;;  %s3017_s15 = inlined_call_operand.vmem [shape: f32[3,1,128], index: 15, kind: input, shape index: {}]   ;;  %s3018_s16 = inlined_call_operand.vmem [shape: f32[3,1,128], index: 16, kind: input, shape index: {}]   ;;  %s3019_s17 = inlined_call_operand.vmem [shape: bf16[3,128,128], index: 17, kind: input, shape index: {}]   ;;  %s3020_s18 = inlined_call_operand.vmem [shape: f32[3,1,128], index: 18, kind: input, shape index: {}]   ;;  %s3021_s19 = inlined_call_operand.vmem [shape: f32[3,1,128], index: 19, kind: input, shape index: {}]   ;;  %s3022_s20 = inlined_call_operand.vmem [shape: bf16[3,128,128], index: 20, kind: input, shape index: {}]   ;;  %s3023_s21 = inlined_call_operand.vmem [shape: f32[1,128], index: 21, kind: input, shape index: {}]   ;;  %s3024_s22 = inlined_call_operand.vmem [shape: f32[8,128], index: 22, kind: output, shape index: {}]  }
   0x1   :  { %3028 = sst [smem:[#allocation5_spill]] %s3002_s0 }
   0x2   :  { %3029 = sst [smem:[#allocation6_spill]] %s3003_s1 }
   0x3   :  { %3030 = sst [smem:[#allocation7_spill]] %s3004_s2 }
   0x4   :  { %3031 = sst [smem:[#allocation8_spill]] %s3005_s3 }
   0x5   :  { %3032 = sst [smem:[#allocation9_spill]] %s3006_s4 }
   0x6   :  { %3033 = sst [smem:[#allocation10_spill]] %s3007_s5 }
   0x7   :  { %3034 = sst [smem:[#allocation11_spill]] %s3008_s6 }
   0x8   :  { %27 = vsyncpa [#allocation3], 0  ;;  %s3035_s29 = sld [smem:[#allocation5_spill]]  ;;  %s2375_s4 = smov [#allocation2]  }
   0xe   :  { %s33_s30 = sshll.u32 %s3035_s29, 4  ;;  %s34_s30 = int_to_ptr.vmem [resolvable:$true] %s33_s30 }
   0xf   :  { %36 = dma.vmem_to_smem %s34_s30, 16, %s2375_s4, [#allocation3]  }
  0x10   :  { %2373 = dma.done.wait [#allocation3], 16  }
  0x11   :  { %2374 = vsyncadd [#allocation3], 4294967280 }
  0x12   :  { %83 = sfence }
  0x13   :  { %s3036_s1 = sld [smem:[#allocation7_spill]]  ;;  %vm97_vm0 = vcmask 64512   ;;  %v2376_v1 = vmov 0.0   ;;  %vm148_vm1 = vcmask 130048   ;;  %v2210_v13 = vld [vmem:[%s3010_s8 + $0x38] sm:$0xff]  ;;  %v2209_v15 = vld [vmem:[%s3010_s8 + $0x30] sm:$0xff] }
  0x14   :  { %119 = vmatpush.msra.mxu0 %v2376_v1  ;;  %s3037_s26 = sld [smem:[#allocation6_spill]]  ;;  %274 = vmatpush.bf16.msra.mxu3 %v2210_v13  ;;  %v2208_v16 = vld [vmem:[%s3010_s8 + $0x28] sm:$0xff]  ;;  %v2207_v19 = vld [vmem:[%s3010_s8 + $0x20] sm:$0xff]  ;;  %v2206_v22 = vld [vmem:[%s3010_s8 + $0x18] sm:$0xff]  ;;  %vm185_vm2 = vcmask 261120  }
  0x15   :  { %s3038_s29 = sld [smem:[#allocation8_spill]]  ;;  %v2331_v17 = vld [vmem:[%s3009_s7 + $0x8] sm:$0xff]   ;;  %v2308_v21 = vld [vmem:[%s3009_s7] sm:$0xff]   ;;  %v2205_v38 = vld [vmem:[%s3010_s8 + $0x10] sm:$0xff] }
  0x16   :  { %v2313_v20 = vunpack.c.l.bf16 %v2331_v17  ;;  %v2310_v23 = vunpack.c.h.bf16 %v2308_v21  ;;  %v2314_v24 = vunpack.c.h.bf16 %v2331_v17  ;;  %v2309_v25 = vunpack.c.l.bf16 %v2308_v21  ;;  %s3039_s23 = sld [smem:[#allocation9_spill]]  ;;  %v2204_v39 = vld [vmem:[%s3010_s8 + $0x8] sm:$0xff]  ;;  %v2203_v40 = vld [vmem:[%s3010_s8] sm:$0xff]  ;;  %v2218_v41 = vld [vmem:[%s3013_s11 + $0x38] sm:$0xff] }
  0x17   :  { %367 = vmatpush.bf16.msrb.mxu0 %v2218_v41  ;;  %v2217_v42 = vld [vmem:[%s3013_s11 + $0x30] sm:$0xff]  ;;  %v2216_v43 = vld [vmem:[%s3013_s11 + $0x28] sm:$0xff]  ;;  %v2215_v44 = vld [vmem:[%s3013_s11 + $0x20] sm:$0xff] }
  0x18   :  { %275 = vmatpush.bf16.msra.mxu3 %v2209_v15  ;;  %v2214_v53 = vld [vmem:[%s3013_s11 + $0x18] sm:$0xff]  ;;  %v2213_v54 = vld [vmem:[%s3013_s11 + $0x10] sm:$0xff]  ;;  %v2212_v55 = vld [vmem:[%s3013_s11 + $0x8] sm:$0xff] }
  0x19   :  { %v2499_v0 = vld [vmem:[%s3036_s1] sm:$0xff]  ;;  %v2506_v2 = vld [vmem:[%s3036_s1 + $0x8] sm:$0xff]  ;;  %s1759_s1 = sld [smem:[#allocation2 + $0x1]] }
  0x1a   :  { %1604 = vmatmul.msk.f32.vlgmr.msra.gmra.mxu0 %vm97_vm0, %v2499_v0  ;;  %v85_v4 = vld [vmem:[%s3037_s26] sm:$0xff]  ;;  %v86_v5 = vld [vmem:[%s3037_s26 + $0x8] sm:$0xff]  ;;  %s3041_s26 = sld [smem:[#allocation10_spill]] }
  0x1b   :  { %v2519_v10 = vld [vmem:[%s3038_s29] sm:$0xff]  ;;  %v2526_v11 = vld [vmem:[%s3038_s29 + $0x8] sm:$0xff]  ;;  %368 = vmatpush.bf16.msrb.mxu0 %v2217_v42 }
  0x1c   :  { %276 = vmatpush.bf16.msra.mxu3 %v2208_v16  ;;  %v2554_v37 = vld [vmem:[%s3039_s23] sm:$0xff]  ;;  %s203_s23 = sld [smem:[#allocation2]]  ;;  %v2230_v16 = vld [vmem:[%s3016_s14 + $0x18] sm:$0xff] }
  0x1d   :  { %v2211_v56 = vld [vmem:[%s3013_s11] sm:$0xff] }
  0x1e   :  { %v2340_v58 = vld [vmem:[%s3011_s9] ss:$0 sm:$0xff] }
  0x1f   :  { %369 = vmatpush.bf16.msrb.mxu0 %v2216_v43  ;;  %v2341_v60 = vld [vmem:[%s3012_s10] ss:$0 sm:$0xff] }
  0x20   :  { %277 = vmatpush.bf16.msra.mxu3 %v2207_v19  ;;  %v2231_v13 = vld [vmem:[%s3016_s14 + $0x20] sm:$0xff]  ;;  %v2229_v19 = vld [vmem:[%s3016_s14 + $0x10] sm:$0xff] }
  0x21   :  { %v2342_v15 = vld [vmem:[%s3014_s12] ss:$0 sm:$0xff] }
  0x22   :  { %1605 = vmatmul.msk.f32.gmra.mxu0 %vm97_vm0, %v2506_v2  ;;  %v204_v46 = vstv %s203_s23  ;;  %s3040_s23 = sld [smem:[#allocation11_spill]]  ;;  %v2235_v41 = vld [vmem:[%s3019_s17] sm:$0xff] }
  0x23   :  { %370 = vmatpush.bf16.msrb.mxu0 %v2215_v44  ;;  %v2344_v42 = vld [vmem:[%s3017_s15] ss:$0 sm:$0xff] }
  0x24   :  { %278 = vmatpush.bf16.msra.mxu3 %v2206_v22  ;;  %v2345_v43 = vld [vmem:[%s3018_s16] ss:$0 sm:$0xff] }
  0x27   :  { %371 = vmatpush.bf16.msrb.mxu0 %v2214_v53 }
  0x28   :  { %279 = vmatpush.bf16.msra.mxu3 %v2205_v38 }
  0x2b   :  { %372 = vmatpush.bf16.msrb.mxu0 %v2213_v54 }
  0x2c   :  { %280 = vmatpush.bf16.msra.mxu3 %v2204_v39 }
  0x2f   :  { %373 = vmatpush.bf16.msrb.mxu0 %v2212_v55 }
  0x30   :  { %281 = vmatpush.bf16.msra.mxu3 %v2203_v40  ;;  %v2236_v40 = vld [vmem:[%s3019_s17 + $0x8] sm:$0xff] }
  0x33   :  { %374 = vmatpush.bf16.msrb.mxu0 %v2211_v56 }
  0x97   :  { %v121_v3 = vpop.f32.mrf.mxu0 }
  0x98   :  { %v127_v7 = vadd.f32 %v121_v3, %v85_v4 }
  0x9a   :  { %v205_v47 = vmul.f32 %v204_v46, %v127_v7 }
  0x9f   :  { %v124_v6 = vpop.f32.mrf.mxu0 }
  0xa0   :  { %v128_v8 = vadd.f32 %v124_v6, %v86_v5  ;;  %v96_v6 = vld [vmem:[%s3040_s23] sm:$0xff] }
  0xa2   :  { %v129_v9 = vpack.c.bf16 %v128_v8, %v127_v7  ;;  %v206_v48 = vmul.f32 %v204_v46, %v128_v8  ;;  %v2234_v7 = vld [vmem:[%s3016_s14 + $0x38] sm:$0xff]  ;;  %v2377_v8 = vmov 0  }
  0xa3   :  { %2339 = vset.pattern.permute.xlu0 %v2377_v8 }
  0xa4   :  { %162 = vmatpush.bf16.msra.mxu1 %v129_v9  ;;  %414 = vperm.xlu0 %2339, %v96_v6   ;;  %v2233_v9 = vld [vmem:[%s3016_s14 + $0x30] sm:$0xff] }
  0xa7   :  { %1614 = vmatmul.msk.bf16.vlgmr.msra.gmra.mxu1 %vm148_vm1, %v2519_v10 }
  0xa8   :  { %501 = vmatpush.bf16.msrb.mxu1 %v2234_v7  ;;  %v2247_v7 = vld [vmem:[%s3010_s8 + $0x60] sm:$0xff] }
  0xac   :  { %502 = vmatpush.bf16.msrb.mxu1 %v2233_v9  ;;  %v2332_v9 = vld [vmem:[%s3009_s7 + $0x10] sm:$0xff]  }
  0xb7   :  { %1615 = vmatmul.msk.bf16.gmra.mxu1 %vm148_vm1, %v2526_v11 }
 0x124   :  { %v164_v12 = vpop.f32.mrf.mxu1 }
 0x125   :  { %v165_v30 = vadd.f32 %v2309_v25, %v164_v12  ;;  %v2232_v12 = vld [vmem:[%s3016_s14 + $0x28] sm:$0xff] }
 0x126   :  { %503 = vmatpush.bf16.msrb.mxu1 %v2232_v12  ;;  %v2246_v12 = vld [vmem:[%s3010_s8 + $0x58] sm:$0xff] }
 0x127   :  { %v174_v35 = vmax.f32 %v165_v30, 0.0  ;;  %v2242_v30 = vld [vmem:[%s3019_s17 + $0x38] sm:$0xff] }
 0x12a   :  { %504 = vmatpush.bf16.msrb.mxu1 %v2231_v13  ;;  %v2318_v13 = vunpack.c.h.bf16 %v2332_v9 }
 0x12c   :  { %v166_v14 = vpop.f32.mrf.mxu1 }
 0x12d   :  { %v167_v28 = vadd.f32 %v2310_v23, %v166_v14  ;;  %v2228_v23 = vld [vmem:[%s3016_s14 + $0x8] sm:$0xff] }
 0x12e   :  { %505 = vmatpush.bf16.msrb.mxu1 %v2230_v16 }
 0x12f   :  { %v175_v33 = vmax.f32 %v167_v28, 0.0  ;;  %v2630_v28 = vld [vmem:[%s3041_s26] sm:$0xf] }
 0x131   :  { %v178_v36 = vpack.c.bf16 %v175_v33, %v174_v35  ;;  %v2239_v33 = vld [vmem:[%s3019_s17 + $0x20] sm:$0xff]  ;;  %v2237_v35 = vld [vmem:[%s3019_s17 + $0x10] sm:$0xff] }
 0x132   :  { %506 = vmatpush.bf16.msrb.mxu1 %v2229_v19 }
 0x134   :  { %v169_v18 = vpop.f32.mrf.mxu1 }
 0x135   :  { %v170_v26 = vadd.f32 %v2313_v20, %v169_v18  ;;  %v2343_v18 = vld [vmem:[%s3015_s13] ss:$0 sm:$0xff] }
 0x136   :  { %507 = vmatpush.bf16.msrb.mxu1 %v2228_v23 }
 0x137   :  { %v176_v31 = vmax.f32 %v170_v26, 0.0 }
 0x13c   :  { %v171_v27 = vpop.f32.mrf.mxu1 }
 0x13d   :  { %v172_v29 = vadd.f32 %v2314_v24, %v171_v27 }
 0x13f   :  { %v177_v32 = vmax.f32 %v172_v29, 0.0  ;;  %v2227_v29 = vld [vmem:[%s3016_s14] sm:$0xff] }
 0x140   :  { %508 = vmatpush.bf16.msrb.mxu1 %v2227_v29  ;;  %v2244_v29 = vld [vmem:[%s3010_s8 + $0x48] sm:$0xff] }
 0x141   :  { %v179_v34 = vpack.c.bf16 %v177_v32, %v176_v31  ;;  %v2241_v31 = vld [vmem:[%s3019_s17 + $0x30] sm:$0xff]  ;;  %v2240_v32 = vld [vmem:[%s3019_s17 + $0x28] sm:$0xff] }
 0x143   :  { %195 = vmatpush.bf16.msra.mxu2 %v179_v34  ;;  %v2238_v34 = vld [vmem:[%s3019_s17 + $0x18] sm:$0xff] }
 0x147   :  { %196 = vmatpush.bf16.msra.mxu2 %v178_v36 }
 0x14a   :  { %1620 = vmatmul.msk.bf16.vlgmr.msra.gmra.mxu2 %vm185_vm2, %v2554_v37 }
 0x1cd   :  { %v198_v45 = vpop.f32.mrf.mxu2 }
 0x1ce   :  { %v207_v50 = vadd.f32 %v205_v47, %v198_v45 }
 0x1d5   :  { %v200_v49 = vpop.f32.mrf.mxu2 }
 0x1d6   :  { %v208_v51 = vadd.f32 %v206_v48, %v200_v49 }
 0x1d8   :  { %v209_v52 = vpack.c.bf16 %v208_v51, %v207_v50  ;;  %v2346_v50 = vld [vmem:[%s3020_s18] ss:$0 sm:$0xff] }
 0x1d9   :  { %v2347_v51 = vld [vmem:[%s3021_s19] ss:$0 sm:$0xff] }
 0x1da   :  { %282 = vmatmul.bf16.vlgmr.msra.gmra.mxu3 %v209_v52 }
 0x25d   :  { %v283_v57 = vpop.f32.mrf.mxu3 }
 0x25e   :  { %v292_v59 = vmul.f32 %v2340_v58, %v283_v57 }
 0x260   :  { %v298_v62 = vadd.f32 %v2341_v60, %v292_v59 }
 0x262   :  { %v300_v3 = vmax.f32 %v298_v62, 0.0 }
 0x265   :  { %v285_v61 = vpop.f32.mrf.mxu3 }
 0x266   :  { %v293_v63 = vmul.f32 %v2340_v58, %v285_v61 }
 0x268   :  { %v299_v1 = vadd.f32 %v2341_v60, %v293_v63  ;;  %v2250_v63 = vld [vmem:[%s3010_s8 + $0x78] sm:$0xff] }
 0x26a   :  { %v301_v4 = vmax.f32 %v299_v1, 0.0 }
 0x26c   :  { %v302_v5 = vpack.c.bf16 %v301_v4, %v300_v3  ;;  %v2249_v3 = vld [vmem:[%s3010_s8 + $0x70] sm:$0xff]  ;;  %v2248_v4 = vld [vmem:[%s3010_s8 + $0x68] sm:$0xff] }
 0x26e   :  { %375 = vmatmul.bf16.vlgmr.msrb.gmra.mxu0 %v302_v5  ;;  %v2333_v5 = vld [vmem:[%s3009_s7 + $0x18] sm:$0xff]  }
 0x26f   :  { %v2321_v8 = vunpack.c.l.bf16 %v2333_v5 }
 0x2eb   :  { %v376_v14 = vpop.f32.mrf.mxu0 }
 0x2ec   :  { %v385_v17 = vmul.f32 %v2342_v15, %v376_v14  ;;  %v2322_v14 = vunpack.c.h.bf16 %v2333_v5 }
 0x2ee   :  { %v391_v21 = vadd.f32 %v2343_v18, %v385_v17 }
 0x2f0   :  { %v393_v25 = vmax.f32 %v391_v21, 0.0 }
 0x2f3   :  { %v378_v20 = vpop.f32.mrf.mxu0 }
 0x2f4   :  { %v386_v22 = vmul.f32 %v2342_v15, %v378_v20  ;;  %v2317_v15 = vunpack.c.l.bf16 %v2332_v9  ;;  %v2226_v9 = vld [vmem:[%s3022_s20 + $0x38] sm:$0xff] }
 0x2f6   :  { %v392_v24 = vadd.f32 %v2343_v18, %v386_v22 }
 0x2f8   :  { %v394_v26 = vmax.f32 %v392_v24, 0.0 }
 0x2fa   :  { %v395_v27 = vpack.c.bf16 %v394_v26, %v393_v25 }
 0x2fc   :  { %406 = vmatpush.bf16.msrb.mxu2 %v395_v27  ;;  %v2245_v27 = vld [vmem:[%s3010_s8 + $0x50] sm:$0xff] }
 0x2ff   :  { %1685 = vmatmul.msk.bf16.vlgmr.msrb.gmra.mxu2 %vm148_vm1, %v2630_v28 }
 0x300   :  { %590 = vmatpush.bf16.msra.mxu2 %v2242_v30  ;;  %v2243_v30 = vld [vmem:[%s3010_s8 + $0x40] sm:$0xff] }
 0x304   :  { %591 = vmatpush.bf16.msra.mxu2 %v2241_v31  ;;  %v2258_v31 = vld [vmem:[%s3013_s11 + $0x78] sm:$0xff] }
 0x308   :  { %592 = vmatpush.bf16.msra.mxu2 %v2240_v32  ;;  %v2257_v32 = vld [vmem:[%s3013_s11 + $0x70] sm:$0xff] }
 0x30c   :  { %593 = vmatpush.bf16.msra.mxu2 %v2239_v33  ;;  %v2256_v33 = vld [vmem:[%s3013_s11 + $0x68] sm:$0xff] }
 0x310   :  { %594 = vmatpush.bf16.msra.mxu2 %v2238_v34  ;;  %v2255_v34 = vld [vmem:[%s3013_s11 + $0x60] sm:$0xff] }
 0x314   :  { %595 = vmatpush.bf16.msra.mxu2 %v2237_v35 }
 0x318   :  { %596 = vmatpush.bf16.msra.mxu2 %v2236_v40 }
 0x31c   :  { %597 = vmatpush.bf16.msra.mxu2 %v2235_v41 }
 0x382   :  { %v2655_v36 = vpop.f32.mrf.mxu2 }
 0x383   :  { %v436_v38 = vpack.c.bf16 %v2655_v36, %v2655_v36 }
 0x385   :  { %509 = vmatmul.bf16.vlgmr.msrb.gmra.mxu1 %v436_v38  ;;  %v690_v38 = vstv %s1759_s1 }
 0x38a   :  { %v410_v39 = vpop.f32.mrf.mxu2 }
 0x402   :  { %v510_v44 = vpop.f32.mrf.mxu1 }
 0x403   :  { %v518_v45 = vmul.f32 %v2344_v42, %v510_v44 }
 0x405   :  { %v523_v46 = vadd.f32 %v2345_v43, %v518_v45  ;;  %v2254_v45 = vld [vmem:[%s3013_s11 + $0x58] sm:$0xff] }
 0x407   :  { %v524_v47 = vmax.f32 %v523_v46, 0.0  ;;  %v2253_v46 = vld [vmem:[%s3013_s11 + $0x50] sm:$0xff] }
 0x409   :  { %v525_v48 = vpack.c.bf16 %v524_v47, %v524_v47  ;;  %v2252_v47 = vld [vmem:[%s3013_s11 + $0x48] sm:$0xff] }
 0x40a   :  { %v512_v49 = vpop.f32.mrf.mxu1 }
 0x40b   :  { %598 = vmatmul.bf16.vlgmr.msra.gmra.mxu2 %v525_v48  ;;  %v2251_v48 = vld [vmem:[%s3013_s11 + $0x40] sm:$0xff] }
 0x48e   :  { %v599_v52 = vpop.f32.mrf.mxu2 }
 0x48f   :  { %v607_v53 = vmul.f32 %v2346_v50, %v599_v52  ;;  %v2348_v50 = vld [vmem:[%s3011_s9 + $0x1] ss:$0 sm:$0xff] }
 0x490   :  { %v2349_v52 = vld [vmem:[%s3012_s10 + $0x1] ss:$0 sm:$0xff] }
 0x491   :  { %v612_v54 = vadd.f32 %v2347_v51, %v607_v53 }
 0x493   :  { %v2677_v55 = vmax.f32 %v612_v54, 0.0 }
 0x495   :  { %630 = vmatpush.msrb.mxu3 %v2677_v55 }
 0x496   :  { %v601_v56 = vpop.f32.mrf.mxu2  ;;  %1750 = vmatmul.msk.f32.vlgmr.msrb.gmra.mxu3 %vm97_vm0, %v2499_v0 }
 0x497   :  { %761 = vmatpush.bf16.msra.mxu3 %v2250_v63 }
 0x49b   :  { %762 = vmatpush.bf16.msra.mxu3 %v2249_v3 }
 0x49e   :  { %1751 = vmatmul.msk.f32.gmra.mxu3 %vm97_vm0, %v2506_v2 }
 0x49f   :  { %763 = vmatpush.bf16.msra.mxu3 %v2248_v4 }
 0x4a3   :  { %764 = vmatpush.bf16.msra.mxu3 %v2247_v7 }
 0x4a7   :  { %765 = vmatpush.bf16.msra.mxu3 %v2246_v12 }
 0x4ab   :  { %766 = vmatpush.bf16.msra.mxu3 %v2245_v27  ;;  %v2221_v27 = vld [vmem:[%s3022_s20 + $0x10] sm:$0xff] }
 0x4af   :  { %767 = vmatpush.bf16.msra.mxu3 %v2244_v29  ;;  %v2261_v29 = vld [vmem:[%s3022_s20 + $0x50] sm:$0xff] }
 0x4b3   :  { %768 = vmatpush.bf16.msra.mxu3 %v2243_v30  ;;  %v2269_v30 = vld [vmem:[%s3016_s14 + $0x50] sm:$0xff] }
 0x519   :  { %v632_v57 = vpop.f32.mrf.mxu3 }
 0x51a   :  { %v638_v59 = vadd.f32 %v632_v57, %v393_v25 }
 0x51c   :  { %v691_v39 = vmul.f32 %v690_v38, %v638_v59 }
 0x521   :  { %v635_v58 = vpop.f32.mrf.mxu3 }
 0x522   :  { %v639_v60 = vadd.f32 %v635_v58, %v394_v26 }
 0x524   :  { %v640_v61 = vpack.c.bf16 %v639_v60, %v638_v59  ;;  %v692_v40 = vmul.f32 %v690_v38, %v639_v60 }
 0x526   :  { %657 = vmatpush.bf16.msra.mxu0 %v640_v61 }
 0x529   :  { %1756 = vmatmul.msk.bf16.vlgmr.msra.gmra.mxu0 %vm148_vm1, %v2519_v10 }
 0x52a   :  { %857 = vmatpush.bf16.msrb.mxu0 %v2258_v31  ;;  %v2220_v31 = vld [vmem:[%s3022_s20 + $0x8] sm:$0xff] }
 0x52e   :  { %858 = vmatpush.bf16.msrb.mxu0 %v2257_v32  ;;  %v2260_v32 = vld [vmem:[%s3022_s20 + $0x48] sm:$0xff] }
 0x532   :  { %859 = vmatpush.bf16.msrb.mxu0 %v2256_v33  ;;  %v2268_v33 = vld [vmem:[%s3016_s14 + $0x48] sm:$0xff] }
 0x536   :  { %860 = vmatpush.bf16.msrb.mxu0 %v2255_v34  ;;  %v2831_v34 = vpop.permute.xlu0 %414 }
 0x537   :  { %v417_v38 = vmul.f32 %v2831_v34, %v2655_v36 }
 0x539   :  { %1757 = vmatmul.msk.bf16.gmra.mxu0 %vm148_vm1, %v2526_v11 }
 0x53a   :  { %861 = vmatpush.bf16.msrb.mxu0 %v2254_v45 }
 0x53e   :  { %862 = vmatpush.bf16.msrb.mxu0 %v2253_v46  ;;  %v2282_v46 = vld [vmem:[%s3019_s17 + $0x78] sm:$0xff] }
 0x542   :  { %863 = vmatpush.bf16.msrb.mxu0 %v2252_v47  ;;  %v2281_v47 = vld [vmem:[%s3019_s17 + $0x70] sm:$0xff] }
 0x546   :  { %864 = vmatpush.bf16.msrb.mxu0 %v2251_v48 }
 0x54a   :  { %1201 = vmatpush.bf16.msra.mxu0 %v2282_v46  ;;  %v2283_v46 = vld [vmem:[%s3010_s8 + $0x80] sm:$0xff] }
 0x54e   :  { %1202 = vmatpush.bf16.msra.mxu0 %v2281_v47  ;;  %v2298_v47 = vld [vmem:[%s3013_s11 + $0xb8] sm:$0xff] }
 0x5a6   :  { %v659_v62 = vpop.f32.mrf.mxu0 }
 0x5a7   :  { %v660_v20 = vadd.f32 %v2317_v15, %v659_v62  ;;  %v2350_v62 = vld [vmem:[%s3014_s12 + $0x1] ss:$0 sm:$0xff]  ;;  %v2225_v15 = vld [vmem:[%s3022_s20 + $0x30] sm:$0xff] }
 0x5a9   :  { %v669_v25 = vmax.f32 %v660_v20, 0.0  ;;  %v2272_v20 = vld [vmem:[%s3016_s14 + $0x68] sm:$0xff] }
 0x5ae   :  { %v661_v1 = vpop.f32.mrf.mxu0 }
 0x5af   :  { %v662_v18 = vadd.f32 %v2318_v13, %v661_v1  ;;  %v2351_v1 = vld [vmem:[%s3015_s13 + $0x1] ss:$0 sm:$0xff]  ;;  %v2266_v13 = vld [vmem:[%s3022_s20 + $0x78] sm:$0xff] }
 0x5b0   :  { %968 = vmatpush.bf16.msrb.mxu2 %v2266_v13  ;;  %v2355_v13 = vld [vmem:[%s3021_s19 + $0x1] ss:$0 sm:$0xff] }
 0x5b1   :  { %v670_v23 = vmax.f32 %v662_v18, 0.0  ;;  %v2224_v18 = vld [vmem:[%s3022_s20 + $0x28] sm:$0xff] }
 0x5b3   :  { %v673_v26 = vpack.c.bf16 %v670_v23, %v669_v25  ;;  %v2271_v23 = vld [vmem:[%s3016_s14 + $0x60] sm:$0xff]  ;;  %v2262_v25 = vld [vmem:[%s3022_s20 + $0x58] sm:$0xff] }
 0x5b6   :  { %v664_v6 = vpop.f32.mrf.mxu0 }
 0x5b7   :  { %v665_v16 = vadd.f32 %v2321_v8, %v664_v6 }
 0x5b9   :  { %v671_v21 = vmax.f32 %v665_v16, 0.0  ;;  %v2265_v16 = vld [vmem:[%s3022_s20 + $0x70] sm:$0xff] }
 0x5ba   :  { %969 = vmatpush.bf16.msrb.mxu2 %v2265_v16 }
 0x5be   :  { %v666_v17 = vpop.f32.mrf.mxu0 }
 0x5bf   :  { %v667_v19 = vadd.f32 %v2322_v14, %v666_v17  ;;  %v2274_v14 = vld [vmem:[%s3016_s14 + $0x78] sm:$0xff]  ;;  %v2273_v17 = vld [vmem:[%s3016_s14 + $0x70] sm:$0xff] }
 0x5c0   :  { %1109 = vmatpush.bf16.msrb.mxu3 %v2274_v14 }
 0x5c1   :  { %v672_v22 = vmax.f32 %v667_v19, 0.0  ;;  %v2264_v19 = vld [vmem:[%s3022_s20 + $0x68] sm:$0xff] }
 0x5c2   :  { %970 = vmatpush.bf16.msrb.mxu2 %v2264_v19 }
 0x5c3   :  { %v674_v24 = vpack.c.bf16 %v672_v22, %v671_v21  ;;  %v2223_v21 = vld [vmem:[%s3022_s20 + $0x20] sm:$0xff] }
 0x5c4   :  { %1110 = vmatpush.bf16.msrb.mxu3 %v2273_v17  ;;  %v2263_v22 = vld [vmem:[%s3022_s20 + $0x60] sm:$0xff] }
 0x5c5   :  { %681 = vmatpush.bf16.msra.mxu1 %v674_v24  ;;  %v2222_v24 = vld [vmem:[%s3022_s20 + $0x18] sm:$0xff] }
 0x5c6   :  { %971 = vmatpush.bf16.msrb.mxu2 %v2263_v22 }
 0x5c8   :  { %1111 = vmatpush.bf16.msrb.mxu3 %v2272_v20 }
 0x5c9   :  { %682 = vmatpush.bf16.msra.mxu1 %v673_v26  ;;  %v2270_v26 = vld [vmem:[%s3016_s14 + $0x58] sm:$0xff] }
 0x5ca   :  { %972 = vmatpush.bf16.msrb.mxu2 %v2262_v25  ;;  %v2334_v25 = vld [vmem:[%s3009_s7 + $0x20] sm:$0xff]  }
 0x5cc   :  { %1758 = vmatmul.msk.bf16.vlgmr.msra.gmra.mxu1 %vm185_vm2, %v2554_v37  ;;  %1112 = vmatpush.bf16.msrb.mxu3 %v2271_v23 }
 0x5ce   :  { %973 = vmatpush.bf16.msrb.mxu2 %v2261_v29 }
 0x5d0   :  { %1113 = vmatpush.bf16.msrb.mxu3 %v2270_v26  ;;  %v2286_v26 = vld [vmem:[%s3010_s8 + $0x98] sm:$0xff] }
 0x5d2   :  { %974 = vmatpush.bf16.msrb.mxu2 %v2260_v32 }
 0x5d4   :  { %1114 = vmatpush.bf16.msrb.mxu3 %v2269_v30  ;;  %v2325_v30 = vunpack.c.l.bf16 %v2334_v25 }
 0x5d8   :  { %1115 = vmatpush.bf16.msrb.mxu3 %v2268_v33 }
 0x649   :  { %v684_v35 = vpop.f32.mrf.mxu1 }
 0x64a   :  { %v693_v42 = vadd.f32 %v691_v39, %v684_v35  ;;  %v2219_v35 = vld [vmem:[%s3022_s20] sm:$0xff]  ;;  %v418_v39 = vpack.c.bf16 %v417_v38, %v417_v38 }
 0x651   :  { %v686_v41 = vpop.f32.mrf.mxu1 }
 0x652   :  { %v694_v43 = vadd.f32 %v692_v40, %v686_v41  ;;  %v2259_v40 = vld [vmem:[%s3022_s20 + $0x40] sm:$0xff] }
 0x653   :  { %v2267_v41 = vld [vmem:[%s3016_s14 + $0x40] sm:$0xff]  ;;  %975 = vmatpush.bf16.msrb.mxu2 %v2259_v40 }
 0x654   :  { %v695_v44 = vpack.c.bf16 %v694_v43, %v693_v42  ;;  %1116 = vmatpush.bf16.msrb.mxu3 %v2267_v41 }
 0x656   :  { %769 = vmatmul.bf16.vlgmr.msra.gmra.mxu3 %v695_v44 }
 0x6d9   :  { %v770_v49 = vpop.f32.mrf.mxu3 }
 0x6da   :  { %v780_v51 = vmul.f32 %v2348_v50, %v770_v49  ;;  %v2280_v49 = vld [vmem:[%s3019_s17 + $0x68] sm:$0xff] }
 0x6db   :  { %1203 = vmatpush.bf16.msra.mxu0 %v2280_v49  ;;  %v2295_v49 = vld [vmem:[%s3013_s11 + $0xa0] sm:$0xff] }
 0x6dc   :  { %v787_v54 = vadd.f32 %v2349_v52, %v780_v51  ;;  %v2278_v51 = vld [vmem:[%s3019_s17 + $0x58] sm:$0xff] }
 0x6de   :  { %v789_v58 = vmax.f32 %v787_v54, 0.0 }
 0x6e1   :  { %v772_v53 = vpop.f32.mrf.mxu3 }
 0x6e2   :  { %v781_v56 = vmul.f32 %v2348_v50, %v772_v53  ;;  %v2279_v50 = vld [vmem:[%s3019_s17 + $0x60] sm:$0xff] }
 0x6e3   :  { %1204 = vmatpush.bf16.msra.mxu0 %v2279_v50 }
 0x6e4   :  { %v788_v57 = vadd.f32 %v2349_v52, %v781_v56  ;;  %v2277_v52 = vld [vmem:[%s3019_s17 + $0x50] sm:$0xff]  ;;  %v2276_v56 = vld [vmem:[%s3019_s17 + $0x48] sm:$0xff] }
 0x6e6   :  { %v790_v59 = vmax.f32 %v788_v57, 0.0  ;;  %v2275_v57 = vld [vmem:[%s3019_s17 + $0x40] sm:$0xff] }
 0x6e7   :  { %1205 = vmatpush.bf16.msra.mxu0 %v2278_v51 }
 0x6e8   :  { %v791_v60 = vpack.c.bf16 %v790_v59, %v789_v58  ;;  %v2352_v58 = vld [vmem:[%s3017_s15 + $0x1] ss:$0 sm:$0xff] }
 0x6e9   :  { %v2353_v59 = vld [vmem:[%s3018_s16 + $0x1] ss:$0 sm:$0xff] }
 0x6ea   :  { %865 = vmatmul.bf16.vlgmr.msrb.gmra.mxu0 %v791_v60 }
 0x6eb   :  { %1206 = vmatpush.bf16.msra.mxu0 %v2277_v52 }
 0x6ef   :  { %1207 = vmatpush.bf16.msra.mxu0 %v2276_v56 }
 0x6f3   :  { %1208 = vmatpush.bf16.msra.mxu0 %v2275_v57 }
 0x6f7   :  { %1470 = vmatpush.bf16.msrb.mxu0 %v2298_v47 }
 0x767   :  { %v866_v61 = vpop.f32.mrf.mxu0 }
 0x768   :  { %v876_v63 = vmul.f32 %v2350_v62, %v866_v61 }
 0x76a   :  { %v2756_v4 = vadd.f32 %v2351_v1, %v876_v63 }
 0x76c   :  { %v885_v7 = vmax.f32 %v2756_v4, 0.0  ;;  %v2289_v4 = vld [vmem:[%s3010_s8 + $0xb0] sm:$0xff] }
 0x76f   :  { %v868_v3 = vpop.f32.mrf.mxu0 }
 0x770   :  { %v877_v5 = vmul.f32 %v2350_v62, %v868_v3 }
 0x772   :  { %v2758_v6 = vadd.f32 %v2351_v1, %v877_v5 }
 0x774   :  { %v886_v8 = vmax.f32 %v2758_v6, 0.0  ;;  %v2288_v6 = vld [vmem:[%s3010_s8 + $0xa8] sm:$0xff] }
 0x776   :  { %v887_v12 = vpack.c.bf16 %v886_v8, %v885_v7 }
 0x778   :  { %895 = vmatpush.bf16.msrb.mxu1 %v887_v12  ;;  %v2354_v12 = vld [vmem:[%s3020_s18 + $0x1] ss:$0 sm:$0xff] }
 0x77b   :  { %1860 = vmatmul.msk.bf16.vlgmr.msrb.gmra.mxu1 %vm148_vm1, %v2630_v28 }
 0x77c   :  { %1029 = vmatpush.bf16.msra.mxu1 %v2226_v9 }
 0x780   :  { %1030 = vmatpush.bf16.msra.mxu1 %v2225_v15 }
 0x784   :  { %1031 = vmatpush.bf16.msra.mxu1 %v2224_v18 }
 0x788   :  { %1032 = vmatpush.bf16.msra.mxu1 %v2223_v21 }
 0x78c   :  { %1033 = vmatpush.bf16.msra.mxu1 %v2222_v24 }
 0x790   :  { %1034 = vmatpush.bf16.msra.mxu1 %v2221_v27  ;;  %v2326_v27 = vunpack.c.h.bf16 %v2334_v25 }
 0x794   :  { %1035 = vmatpush.bf16.msra.mxu1 %v2220_v31 }
 0x798   :  { %1036 = vmatpush.bf16.msra.mxu1 %v2219_v35 }
 0x79b   :  { %1037 = vmatmul.bf16.vlgmr.msra.gmra.mxu1 %v418_v39 }
 0x7f8   :  { %v897_v42 = vpop.f32.mrf.mxu1 }
 0x7f9   :  { %v901_v43 = vmul.f32 %v897_v42, %v2831_v34  ;;  %v1042_v36 = vadd.f32 %v897_v42, %v2677_v55 }
 0x7fb   :  { %v902_v44 = vpack.c.bf16 %v901_v43, %v901_v43  ;;  %v1043_v45 = vpack.c.bf16 %v1042_v36, %v1042_v36 }
 0x7fd   :  { %976 = vmatmul.bf16.vlgmr.msrb.gmra.mxu2 %v902_v44  ;;  %1117 = vmatmul.bf16.vlgmr.msrb.gmra.mxu3 %v1043_v45  ;;  %v2285_v44 = vld [vmem:[%s3010_s8 + $0x90] sm:$0xff]  ;;  %v2284_v45 = vld [vmem:[%s3010_s8 + $0x88] sm:$0xff] }
 0x800   :  { %v899_v48 = vpop.f32.mrf.mxu1 }
 0x801   :  { %v2296_v48 = vld [vmem:[%s3013_s11 + $0xa8] sm:$0xff] }
 0x818   :  { %v2864_v53 = vpop.f32.mrf.mxu1 }
 0x820   :  { %v1040_v54 = vpop.f32.mrf.mxu1 }
 0x880   :  { %v2878_v60 = vpop.f32.mrf.mxu2  ;;  %v1118_v61 = vpop.f32.mrf.mxu3 }
 0x881   :  { %v1127_v62 = vmul.f32 %v2352_v58, %v1118_v61  ;;  %v2294_v61 = vld [vmem:[%s3013_s11 + $0x98] sm:$0xff] }
 0x883   :  { %v1133_v63 = vadd.f32 %v2353_v59, %v1127_v62  ;;  %v2293_v62 = vld [vmem:[%s3013_s11 + $0x90] sm:$0xff] }
 0x885   :  { %v1134_v1 = vmax.f32 %v1133_v63, 0.0  ;;  %v2292_v63 = vld [vmem:[%s3013_s11 + $0x88] sm:$0xff] }
 0x887   :  { %v1135_v3 = vpack.c.bf16 %v1134_v1, %v1134_v1  ;;  %v2291_v1 = vld [vmem:[%s3013_s11 + $0x80] sm:$0xff] }
 0x888   :  { %v979_v5 = vpop.f32.mrf.mxu2  ;;  %v1120_v9 = vpop.f32.mrf.mxu3 }
 0x889   :  { %1209 = vmatmul.bf16.vlgmr.msra.gmra.mxu0 %v1135_v3  ;;  %v2356_v5 = vld [vmem:[%s3011_s9 + $0x2] ss:$0 sm:$0xff] }
 0x906   :  { %v1210_v14 = vpop.f32.mrf.mxu0 }
 0x907   :  { %v1219_v15 = vmul.f32 %v2354_v12, %v1210_v14  ;;  %v2357_v12 = vld [vmem:[%s3012_s10 + $0x2] ss:$0 sm:$0xff] }
 0x909   :  { %v1225_v16 = vadd.f32 %v2355_v13, %v1219_v15 }
 0x90b   :  { %v1226_v17 = vmax.f32 %v1225_v16, 0.0 }
 0x90d   :  { %v1227_v18 = vadd.f32 %v1226_v17, %v2677_v55 }
 0x90e   :  { %v1212_v19 = vpop.f32.mrf.mxu0 }
 0x90f   :  { %1243 = vmatpush.msra.mxu2 %v1227_v18 }
 0x910   :  { %2041 = vmatmul.msk.f32.vlgmr.msra.gmra.mxu2 %vm97_vm0, %v2499_v0 }
 0x918   :  { %2042 = vmatmul.msk.f32.gmra.mxu2 %vm97_vm0, %v2506_v2  ;;  %v2290_v2 = vld [vmem:[%s3010_s8 + $0xb8] sm:$0xff] }
 0x919   :  { %1374 = vmatpush.bf16.msra.mxu3 %v2290_v2  ;;  %v2358_v2 = vld [vmem:[%s3014_s12 + $0x2] ss:$0 sm:$0xff] }
 0x91d   :  { %1375 = vmatpush.bf16.msra.mxu3 %v2289_v4 }
 0x921   :  { %1376 = vmatpush.bf16.msra.mxu3 %v2288_v6  ;;  %v2359_v6 = vld [vmem:[%s3015_s13 + $0x2] ss:$0 sm:$0xff] }
 0x993   :  { %v1245_v20 = vpop.f32.mrf.mxu2 }
 0x994   :  { %v1251_v22 = vadd.f32 %v1245_v20, %v885_v7  ;;  %v2287_v7 = vld [vmem:[%s3010_s8 + $0xa0] sm:$0xff]  ;;  %s2050_s8 = sld [smem:[#allocation2 + $0x2]]  ;;  %v2306_v20 = vld [vmem:[%s3022_s20 + $0xb8] sm:$0xff] }
 0x995   :  { %1377 = vmatpush.bf16.msra.mxu3 %v2287_v7 }
 0x999   :  { %1378 = vmatpush.bf16.msra.mxu3 %v2286_v26 }
 0x99a   :  { %v1303_v51 = vstv %s2050_s8 }
 0x99b   :  { %v1248_v21 = vpop.f32.mrf.mxu2  ;;  %v1304_v52 = vmul.f32 %v1303_v51, %v1251_v22 }
 0x99c   :  { %v1252_v23 = vadd.f32 %v1248_v21, %v886_v8  ;;  %v2305_v21 = vld [vmem:[%s3022_s20 + $0xb0] sm:$0xff] }
 0x99d   :  { %1379 = vmatpush.bf16.msra.mxu3 %v2285_v44 }
 0x99e   :  { %v1253_v24 = vpack.c.bf16 %v1252_v23, %v1251_v22  ;;  %v1305_v54 = vmul.f32 %v1303_v51, %v1252_v23  ;;  %v2304_v22 = vld [vmem:[%s3022_s20 + $0xa8] sm:$0xff]  ;;  %v2303_v23 = vld [vmem:[%s3022_s20 + $0xa0] sm:$0xff] }
 0x9a0   :  { %1270 = vmatpush.bf16.msrb.mxu1 %v1253_v24 }
 0x9a1   :  { %1380 = vmatpush.bf16.msra.mxu3 %v2284_v45 }
 0x9a3   :  { %2047 = vmatmul.msk.bf16.vlgmr.msrb.gmra.mxu1 %vm148_vm1, %v2519_v10  ;;  %v2335_v10 = vld [vmem:[%s3009_s7 + $0x28] sm:$0xff]  }
 0x9a4   :  { %v2329_v8 = vunpack.c.l.bf16 %v2335_v10  ;;  %v2330_v29 = vunpack.c.h.bf16 %v2335_v10  ;;  %1579 = vmatpush.bf16.msra.mxu1 %v2306_v20 }
 0x9a5   :  { %1381 = vmatpush.bf16.msra.mxu3 %v2283_v46 }
 0x9a8   :  { %1580 = vmatpush.bf16.msra.mxu1 %v2305_v21 }
 0x9ac   :  { %1581 = vmatpush.bf16.msra.mxu1 %v2304_v22 }
 0x9b0   :  { %1582 = vmatpush.bf16.msra.mxu1 %v2303_v23 }
 0x9b3   :  { %2048 = vmatmul.msk.bf16.gmra.mxu1 %vm148_vm1, %v2526_v11 }
 0xa20   :  { %v1272_v0 = vpop.f32.mrf.mxu1 }
 0xa21   :  { %v1273_v38 = vadd.f32 %v2325_v30, %v1272_v0  ;;  %v2302_v0 = vld [vmem:[%s3022_s20 + $0x98] sm:$0xff] }
 0xa22   :  { %1583 = vmatpush.bf16.msra.mxu1 %v2302_v0 }
 0xa23   :  { %v1282_v43 = vmax.f32 %v1273_v38, 0.0 }
 0xa28   :  { %v1274_v55 = vpop.f32.mrf.mxu1 }
 0xa29   :  { %v1275_v33 = vadd.f32 %v2326_v27, %v1274_v55  ;;  %v2301_v55 = vld [vmem:[%s3022_s20 + $0x90] sm:$0xff]  ;;  %v2299_v27 = vld [vmem:[%s3022_s20 + $0x80] sm:$0xff] }
 0xa2a   :  { %1584 = vmatpush.bf16.msra.mxu1 %v2301_v55 }
 0xa2b   :  { %v1283_v41 = vmax.f32 %v1275_v33, 0.0  ;;  %v1039_v33 = vadd.f32 %v2864_v53, %v2878_v60 }
 0xa2d   :  { %v1286_v36 = vpack.c.bf16 %v1283_v41, %v1282_v43 }
 0xa30   :  { %v1277_v11 = vpop.f32.mrf.mxu1 }
 0xa31   :  { %v1278_v31 = vadd.f32 %v2329_v8, %v1277_v11  ;;  %v2300_v11 = vld [vmem:[%s3022_s20 + $0x88] sm:$0xff] }
 0xa32   :  { %1585 = vmatpush.bf16.msra.mxu1 %v2300_v11 }
 0xa33   :  { %v1284_v39 = vmax.f32 %v1278_v31, 0.0 }
 0xa36   :  { %1586 = vmatpush.bf16.msra.mxu1 %v2299_v27 }
 0xa38   :  { %v1279_v32 = vpop.f32.mrf.mxu1 }
 0xa39   :  { %v1280_v35 = vadd.f32 %v2330_v29, %v1279_v32 }
 0xa3b   :  { %v1285_v40 = vmax.f32 %v1280_v35, 0.0  ;;  %v2360_v35 = vld [vmem:[%s3023_s21] ss:$0 sm:$0xff] }
 0xa3d   :  { %v1287_v42 = vpack.c.bf16 %v1285_v40, %v1284_v39 }
 0xa3f   :  { %1294 = vmatpush.bf16.msrb.mxu2 %v1287_v42 }
 0xa43   :  { %1295 = vmatpush.bf16.msrb.mxu2 %v1286_v36 }
 0xa46   :  { %2049 = vmatmul.msk.bf16.vlgmr.msrb.gmra.mxu2 %vm185_vm2, %v2554_v37  ;;  %v2297_v37 = vld [vmem:[%s3013_s11 + $0xb0] sm:$0xff] }
 0xa47   :  { %1471 = vmatpush.bf16.msrb.mxu0 %v2297_v37 }
 0xa4b   :  { %1472 = vmatpush.bf16.msrb.mxu0 %v2296_v48 }
 0xa4f   :  { %1473 = vmatpush.bf16.msrb.mxu0 %v2295_v49 }
 0xa53   :  { %1474 = vmatpush.bf16.msrb.mxu0 %v2294_v61 }
 0xa57   :  { %1475 = vmatpush.bf16.msrb.mxu0 %v2293_v62 }
 0xa5b   :  { %1476 = vmatpush.bf16.msrb.mxu0 %v2292_v63 }
 0xa5f   :  { %1477 = vmatpush.bf16.msrb.mxu0 %v2291_v1 }
 0xac9   :  { %v1297_v50 = vpop.f32.mrf.mxu2 }
 0xaca   :  { %v1306_v57 = vadd.f32 %v1304_v52, %v1297_v50 }
 0xad1   :  { %v1299_v56 = vpop.f32.mrf.mxu2 }
 0xad2   :  { %v1307_v58 = vadd.f32 %v1305_v54, %v1299_v56 }
 0xad4   :  { %v1308_v59 = vpack.c.bf16 %v1307_v58, %v1306_v57 }
 0xad6   :  { %1382 = vmatmul.bf16.vlgmr.msra.gmra.mxu3 %v1308_v59 }
 0xb59   :  { %v1383_v3 = vpop.f32.mrf.mxu3 }
 0xb5a   :  { %v1393_v9 = vmul.f32 %v2356_v5, %v1383_v3 }
 0xb5c   :  { %v1400_v14 = vadd.f32 %v2357_v12, %v1393_v9 }
 0xb5e   :  { %v1402_v17 = vmax.f32 %v1400_v14, 0.0 }
 0xb61   :  { %v1385_v13 = vpop.f32.mrf.mxu3 }
 0xb62   :  { %v1394_v15 = vmul.f32 %v2356_v5, %v1385_v13 }
 0xb64   :  { %v1401_v16 = vadd.f32 %v2357_v12, %v1394_v15 }
 0xb66   :  { %v1403_v18 = vmax.f32 %v1401_v16, 0.0 }
 0xb68   :  { %v1404_v19 = vpack.c.bf16 %v1403_v18, %v1402_v17 }
 0xb6a   :  { %1478 = vmatmul.bf16.vlgmr.msrb.gmra.mxu0 %v1404_v19 }
 0xbe7   :  { %v1479_v24 = vpop.f32.mrf.mxu0 }
 0xbe8   :  { %v1489_v4 = vmul.f32 %v2358_v2, %v1479_v24 }
 0xbea   :  { %v1496_v8 = vadd.f32 %v2359_v6, %v1489_v4 }
 0xbef   :  { %v1481_v10 = vpop.f32.mrf.mxu0 }
 0xbf0   :  { %v1490_v7 = vmul.f32 %v2358_v2, %v1481_v10 }
 0xbf2   :  { %v1497_v25 = vadd.f32 %v2359_v6, %v1490_v7 }
 0xbf4   :  { %v1498_v26 = vpack.c.bf16 %v1497_v25, %v1496_v8 }
 0xbf6   :  { %1506 = vmatpush.bf16.msra.mxu2 %v1498_v26 }
 0xbf9   :  { %2151 = vmatmul.msk.bf16.vlgmr.msra.gmra.mxu2 %vm148_vm1, %v2630_v28 }
 0xc7c   :  { %v1508_v29 = vpop.f32.mrf.mxu2 }
 0xc7d   :  { %v1512_v30 = vmul.f32 %v1508_v29, %v2831_v34 }
 0xc7f   :  { %v1513_v31 = vpack.c.bf16 %v1512_v30, %v1512_v30 }
 0xc81   :  { %1587 = vmatmul.bf16.vlgmr.msra.gmra.mxu1 %v1513_v31 }
 0xc84   :  { %v1510_v32 = vpop.f32.mrf.mxu2 }
 0xcfe   :  { %v1588_v38 = vpop.f32.mrf.mxu1 }
 0xcff   :  { %v1592_v28 = vadd.f32 %v1588_v38, %v1039_v33 }
 0xd01   :  { %v1597_v39 = vadd.f32 %v2360_v35, %v1592_v28 }
 0xd03   :  { %1598 = vst [vmem:[%s3024_s22] sm:$0xff] %v1597_v39 }
 0xd06   :  { %v1590_v40 = vpop.f32.mrf.mxu1 }
 0xd07   :  { %1603 = vsyncpa [#allocation3], 1 }

</bundles_post_ra>
